<compile_context>
chip_gen: v7x
topology: tpu7x:2x2x1
jax: 0.10.0
libtpu: 0.0.40
codegen_flags: <defaults>
</compile_context>

<pallas_src>
import jax
import jax.numpy as jnp
from jax.experimental import pallas as pl
from jax.experimental.pallas import tpu as pltpu  # noqa: F401  (TPU backend)

# ----- small config consistent with the module's forward -----
B = 2
C = 3                       # pe = Linear(ps^2 * 3, hidden) forces 3 channels
IMG = 16
PS = 8
NUM_PATCH = (IMG // PS) ** 2      # 4
N = 1 + NUM_PATCH                 # 5 tokens (patches + appended cls)
BN = B * N                        # 10 total rows
HIDDEN = 32
NUM_HEADS = 4
HEAD_DIM = HIDDEN // NUM_HEADS    # 8
SCALE = HEAD_DIM ** (-0.5)
NUM_LAYERS = 2
NUM_CLASS = 16
RATIO = 4
PATCH_DIM = PS * PS * C           # 192
LN_EPS = 1e-5

LANES = 128                       # slab lane width (one lane tile)
SUBLANE = 8                       # slab row alignment (sublane tile)


def _round_up(n, m):
    return -(-n // m) * m


def _layout(entries):
    """entries: [(name, rows, cols)] -> ({name: (row_off, rows, cols)}, total_rows).
    Every section starts on an 8-row (sublane) boundary."""
    off, r = {}, 0
    for name, rows, cols in entries:
        off[name] = (r, rows, cols)
        r += _round_up(rows, SUBLANE)
    return off, r


# --- slab 1: structural constants, LN affine, base term, all biases ---
_CONST_ENTRIES = [
    ("avg",    BN, BN),                  # block-diag, already * 1/(N*HIDDEN)
    ("mask",   BN, NUM_HEADS * BN),      # additive cross-batch mask, tiled per head
    ("headm",  NUM_HEADS * BN, HIDDEN),  # 0/1 head-column mask; ALSO the denom matrix
    ("base",   BN, HIDDEN),              # (pe_bias | cls) + positional embedding
    ("lnw",    BN, HIDDEN),
    ("lnb",    BN, HIDDEN),
    ("sel",    B, BN),                   # token-0 selector per batch element
    ("q_b",    1, HIDDEN),
    ("k_b",    1, HIDDEN),
    ("v_b",    1, HIDDEN),
    ("proj_b", 1, HIDDEN),
    ("b1",     1, RATIO * HIDDEN),
    ("b2",     1, HIDDEN),
    ("fc_b",   1, NUM_CLASS),
]
_CONST_OFF, _CONST_ROWS = _layout(_CONST_ENTRIES)

# --- slab 2: weight matrices ---
_W_ENTRIES = [
    ("pe_w",   PATCH_DIM, HIDDEN),
    ("q_w",    HIDDEN, HIDDEN),
    ("k_w",    HIDDEN, HIDDEN),
    ("v_w",    HIDDEN, HIDDEN),
    ("proj_w", HIDDEN, HIDDEN),          # pre-scaled by SCALE outside the kernel
    ("w1",     HIDDEN, RATIO * HIDDEN),
    ("w2",     RATIO * HIDDEN, HIDDEN),
    ("fc_w",   HIDDEN, NUM_CLASS),
]
_W_OFF, _W_ROWS = _layout(_W_ENTRIES)


def _build_slab(entries, arrs):
    parts = []
    for name, rows, cols in entries:
        a = arrs[name]
        assert a.shape == (rows, cols), (name, a.shape, (rows, cols))
        parts.append(jnp.pad(a.astype(jnp.float32),
                             ((0, _round_up(rows, SUBLANE) - rows),
                              (0, LANES - cols))))
    return jnp.concatenate(parts, axis=0)


# ---------------------------------------------------------------------------
# Single fused kernel: patch embed -> (+cls, +pos) -> NUM_LAYERS encoder
# layers -> fc head.  Activation stays resident; only (B, NUM_CLASS) leaves.
# ---------------------------------------------------------------------------
def _vit_kernel(xp_ref, c_ref, w_ref, o_ref):
    f32 = jnp.float32

    def c(name):                       # sublane-aligned static slice of slab 1
        r, nr, nc = _CONST_OFF[name]
        return c_ref[pl.ds(r, nr), pl.ds(0, nc)]

    def w(name):                       # sublane-aligned static slice of slab 2
        r, nr, nc = _W_OFF[name]
        return w_ref[pl.ds(r, nr), pl.ds(0, nc)]

    avg = c("avg")                     # (BN, BN)
    mask = c("mask")                   # (BN, NH*BN): 0 same-batch, -1e30 cross
    head_m = c("headm")                # (NH*BN, HIDDEN) 0/1 head-column mask
    ln_w = c("lnw")
    ln_b = c("lnb")

    def layer_norm(t):
        # nn.LayerNorm((N, HIDDEN)): stats over BOTH seq and hidden, per batch.
        # Single fused stats matmul on [row_sum, row_sum_sq].
        s1 = jnp.sum(t, axis=1, keepdims=True)              # (BN, 1)
        s2 = jnp.sum(t * t, axis=1, keepdims=True)           # (BN, 1)
        stats = jnp.dot(avg, jnp.concatenate([s1, s2], axis=1),
                        preferred_element_type=f32)           # (BN, 2)
        mu = stats[:, 0:1]
        var = stats[:, 1:2] - mu * mu
        return (t - mu) * jax.lax.rsqrt(var + LN_EPS) * ln_w + ln_b

    # ---- patch embedding + cls token + positional embedding ----
    # xp has an all-zero row at every cls position; `base` carries
    # (pe_bias | cls token) + positional embedding per row.
    seq = jnp.dot(xp_ref[...], w("pe_w"),
                  preferred_element_type=f32) + c("base")     # (BN, H)

    def encoder_layer(x):
        # ---- batched multi-head "attention": k @ q^T, SCALE folded in proj ----
        x_norm = layer_norm(x)
        q = jnp.dot(x_norm, w("q_w"), preferred_element_type=f32) + c("q_b")
        k = jnp.dot(x_norm, w("k_w"), preferred_element_type=f32) + c("k_b")
        v = jnp.dot(x_norm, w("v_w"), preferred_element_type=f32) + c("v_b")

        # Row-tile q/v over heads and zero all but each head's columns.
        q_big = jnp.concatenate([q] * NUM_HEADS, axis=0) * head_m   # (NH*BN, H)
        v_big = jnp.concatenate([v] * NUM_HEADS, axis=0) * head_m   # (NH*BN, H)

        # scores[i, h*BN + j] = sum_{c in head h} k[i,c] * q[j,c] = (k_h @ q_h^T)[i,j]
        s = jax.lax.dot_general(k, q_big, (((1,), (1,)), ((), ())),
                                preferred_element_type=f32) + mask   # (BN, NH*BN)
        # One shared per-row constant; cancels exactly in the num/den ratio.
        s = s - jnp.max(s, axis=-1, keepdims=True)
        e = jnp.exp(s)
        num = jnp.dot(e, v_big, preferred_element_type=f32)          # (BN, H)
        den = jnp.dot(e, head_m, preferred_element_type=f32)         # (BN, H)
        msa = num * pl.reciprocal(den, approx=True)                  # per-head softmax
        msa = jnp.dot(msa, w("proj_w"), preferred_element_type=f32) + c("proj_b")
        x = x + msa                    # residual 1

        # ---- MLP: Linear -> ReLU -> (Dropout=id) -> Linear -> ReLU ----
        y = layer_norm(x)
        h1 = jnp.maximum(
            jnp.dot(y, w("w1"), preferred_element_type=f32) + c("b1"), 0.0)
        h2 = jnp.maximum(
            jnp.dot(h1, w("w2"), preferred_element_type=f32) + c("b2"), 0.0)
        return x + h2                  # residual 2

    for _ in range(NUM_LAYERS):        # all encoder layers share parameters
        seq = encoder_layer(seq)

    # ---- fc head on token 0 of every batch element ----
    cls_tok = jnp.dot(c("sel"), seq, preferred_element_type=f32)     # (B, H)
    o_ref[...] = (jnp.dot(cls_tok, w("fc_w"),
                          preferred_element_type=f32) + c("fc_b"))


# ---------------------------------------------------------------------------
# Wrapper: tiny layout/constant prep (plain XLA), then ONE pallas_call.
# ---------------------------------------------------------------------------
def _structural_constants():
    batch_id = jnp.arange(BN, dtype=jnp.int32) // N
    same = batch_id[:, None] == batch_id[None, :]
    avg_mat = same.astype(jnp.float32) / float(N * HIDDEN)            # (BN, BN)
    attn_mask = jnp.where(same, 0.0, -1e30).astype(jnp.float32)       # (BN, BN)
    mask_big = jnp.tile(attn_mask, (1, NUM_HEADS))                    # (BN, NH*BN)
    head_id = jnp.arange(NUM_HEADS * BN, dtype=jnp.int32) // BN       # (NH*BN,)
    col_head = jnp.arange(HIDDEN, dtype=jnp.int32) // HEAD_DIM        # (HIDDEN,)
    head_m = (head_id[:, None] == col_head[None, :]).astype(jnp.float32)
    sel_mat = jax.nn.one_hot(jnp.arange(B) * N, BN, dtype=jnp.float32)  # (B, BN)
    return avg_mat, mask_big, head_m, sel_mat


@jax.jit
def vit_forward(x, P):
    # "patchify" exactly like torch: plain row-major reshape of NCHW, then
    # append an all-zero row at the cls position of each batch element.
    xp = x.reshape(B, NUM_PATCH, PATCH_DIM)
    xp_pad = jnp.concatenate(
        [xp, jnp.zeros((B, 1, PATCH_DIM), jnp.float32)], axis=1
    ).reshape(BN, PATCH_DIM)

    # per-row additive term: pe bias on patch rows, cls token on cls rows,
    # plus the positional embedding, tiled over the batch.
    is_cls = (jnp.arange(N) == NUM_PATCH)[:, None]                    # (N, 1)
    base = jnp.tile(jnp.where(is_cls, P["cls"], P["pe_b"]) + P["pos"], (B, 1))

    avg_mat, mask_big, head_m, sel_mat = _structural_constants()
    qkv_w, qkv_b = P["qkv_w"], P["qkv_b"]

    const_arrs = dict(
        avg=avg_mat, mask=mask_big, headm=head_m, base=base,
        lnw=jnp.tile(P["ln_w"], (B, 1)), lnb=jnp.tile(P["ln_b"], (B, 1)),
        sel=sel_mat,
        q_b=qkv_b[:, 0 * HIDDEN:1 * HIDDEN],
        k_b=qkv_b[:, 1 * HIDDEN:2 * HIDDEN],
        v_b=qkv_b[:, 2 * HIDDEN:3 * HIDDEN],
        proj_b=P["proj_b"], b1=P["b1"], b2=P["b2"], fc_b=P["fc_b"])
    w_arrs = dict(
        pe_w=P["pe_w"],
        q_w=qkv_w[:, 0 * HIDDEN:1 * HIDDEN],
        k_w=qkv_w[:, 1 * HIDDEN:2 * HIDDEN],
        v_w=qkv_w[:, 2 * HIDDEN:3 * HIDDEN],
        proj_w=P["proj_w"] * SCALE,        # fold post-softmax scale into proj
        w1=P["w1"], w2=P["w2"], fc_w=P["fc_w"])

    const_slab = _build_slab(_CONST_ENTRIES, const_arrs)   # (_CONST_ROWS, 128)
    w_slab = _build_slab(_W_ENTRIES, w_arrs)                # (_W_ROWS, 128)

    return pl.pallas_call(
        _vit_kernel,
        out_shape=jax.ShapeDtypeStruct((B, NUM_CLASS), jnp.float32),
    )(xp_pad, const_slab, w_slab)


# ---------------------------------------------------------------------------
# Pure-JAX reference (mirrors the PyTorch graph) for a correctness check
# ---------------------------------------------------------------------------
def ref_forward(x, P):
    xp = x.reshape(B, NUM_PATCH, PATCH_DIM)
    tok = xp @ P["pe_w"] + P["pe_b"]
    cls = jnp.broadcast_to(P["cls"][None, :, :], (B, 1, HIDDEN))
    seq = jnp.concatenate([tok, cls], axis=1) + P["pos"][None, :, :]

    def ln(t):
        mu = jnp.mean(t, axis=(1, 2), keepdims=True)
        var = jnp.mean((t - mu) ** 2, axis=(1, 2), keepdims=True)
        return (t - mu) / jnp.sqrt(var + LN_EPS) * P["ln_w"] + P["ln_b"]

    def msa(t):
        qkv = t @ P["qkv_w"] + P["qkv_b"]
        qkv = qkv.reshape(B, N, 3, NUM_HEADS, HEAD_DIM).transpose(2, 0, 3, 1, 4)
        q, k, v = qkv[0], qkv[1], qkv[2]
        s = jnp.einsum("bhid,bhjd->bhij", k, q)
        attn = jax.nn.softmax(s, axis=-1) * SCALE
        o = jnp.einsum("bhij,bhjd->bhid", attn, v)
        o = o.transpose(0, 2, 1, 3).reshape(B, N, HIDDEN)
        return o @ P["proj_w"] + P["proj_b"]

    def mlp(t):
        h = jnp.maximum(t @ P["w1"] + P["b1"], 0.0)
        return jnp.maximum(h @ P["w2"] + P["b2"], 0.0)

    for _ in range(NUM_LAYERS):
        xn = ln(seq)
        om = msa(xn) + seq
        seq = mlp(ln(om)) + om
    return seq[:, 0] @ P["fc_w"] + P["fc_b"]


# ---------------------------------------------------------------------------
def init_params(key):
    ks = jax.random.split(key, 8)

    def lin(k, fan_in, fan_out):
        kw, kb = jax.random.split(k)
        w = jax.random.normal(kw, (fan_in, fan_out), jnp.float32) * 0.02
        b = jax.random.normal(kb, (1, fan_out), jnp.float32) * 0.02
        return w, b

    pe_w, pe_b = lin(ks[0], PATCH_DIM, HIDDEN)
    qkv_w, qkv_b = lin(ks[1], HIDDEN, 3 * HIDDEN)
    proj_w, proj_b = lin(ks[2], HIDDEN, HIDDEN)
    w1, b1 = lin(ks[3], HIDDEN, RATIO * HIDDEN)
    w2, b2 = lin(ks[4], RATIO * HIDDEN, HIDDEN)
    fc_w, fc_b = lin(ks[5], HIDDEN, NUM_CLASS)
    pos = jax.random.uniform(ks[6], (N, HIDDEN), jnp.float32)   # torch.rand
    cls = jax.random.uniform(ks[7], (1, HIDDEN), jnp.float32)   # torch.rand
    ln_w = jnp.ones((N, HIDDEN), jnp.float32)                   # LN default
    ln_b = jnp.zeros((N, HIDDEN), jnp.float32)
    return dict(pe_w=pe_w, pe_b=pe_b, qkv_w=qkv_w, qkv_b=qkv_b,
                proj_w=proj_w, proj_b=proj_b, w1=w1, b1=b1, w2=w2, b2=b2,
                fc_w=fc_w, fc_b=fc_b, pos=pos, cls=cls, ln_w=ln_w, ln_b=ln_b)


if __name__ == "__main__":
    key = jax.random.PRNGKey(0)
    k_param, k_x = jax.random.split(key)
    params = init_params(k_param)
    x = jax.random.normal(k_x, (B, C, IMG, IMG), jnp.float32)

    out = vit_forward(x, params)
    out = jax.block_until_ready(out)
    assert out.shape == (B, NUM_CLASS), out.shape

    ref = ref_forward(x, params)
    assert jnp.allclose(out, ref, rtol=1e-3, atol=1e-3), (
        float(jnp.max(jnp.abs(out - ref))))

    print("KERNEL_OK")
</pallas_src>

<mosaic_0001>
module attributes {stable_mosaic.version = 11 : i64} {
  func.func @_vit_kernel(%arg0: memref<10x192xf32, #tpu.memory_space<vmem>>, %arg1: memref<184x128xf32, #tpu.memory_space<vmem>>, %arg2: memref<512x128xf32, #tpu.memory_space<vmem>>, %arg3: memref<2x16xf32, #tpu.memory_space<vmem>>) attributes {dimension_semantics = [], scalar_prefetch = 0 : i64, scratch_operands = 0 : i64, tpu.core_type = #tpu.core_type<tc>} {
    %c0 = arith.constant 0 : index
    %c0_0 = arith.constant 0 : index
    %0 = vector.load %arg1[%c0, %c0_0] : memref<184x128xf32, #tpu.memory_space<vmem>>, vector<10x10xf32>
    %c16 = arith.constant 16 : index
    %c0_1 = arith.constant 0 : index
    %1 = vector.load %arg1[%c16, %c0_1] : memref<184x128xf32, #tpu.memory_space<vmem>>, vector<10x40xf32>
    %c32 = arith.constant 32 : index
    %c0_2 = arith.constant 0 : index
    %2 = vector.load %arg1[%c32, %c0_2] : memref<184x128xf32, #tpu.memory_space<vmem>>, vector<40x32xf32>
    %c88 = arith.constant 88 : index
    %c0_3 = arith.constant 0 : index
    %3 = vector.load %arg1[%c88, %c0_3] : memref<184x128xf32, #tpu.memory_space<vmem>>, vector<10x32xf32>
    %c104 = arith.constant 104 : index
    %c0_4 = arith.constant 0 : index
    %4 = vector.load %arg1[%c104, %c0_4] : memref<184x128xf32, #tpu.memory_space<vmem>>, vector<10x32xf32>
    %c0_5 = arith.constant 0 : index
    %c0_6 = arith.constant 0 : index
    %5 = vector.load %arg0[%c0_5, %c0_6] : memref<10x192xf32, #tpu.memory_space<vmem>>, vector<10x192xf32>
    %c0_7 = arith.constant 0 : index
    %c0_8 = arith.constant 0 : index
    %6 = vector.load %arg2[%c0_7, %c0_8] : memref<512x128xf32, #tpu.memory_space<vmem>>, vector<192x32xf32>
    %cst = arith.constant dense<0.000000e+00> : vector<10x32xf32>
    %7 = tpu.matmul %5, %6, %cst {dimension_numbers = #tpu.dot_dimension_numbers<[1], [0], [0], [1], [0, 0, 1, 1], [], []>} : vector<10x192xf32>, vector<192x32xf32>, vector<10x32xf32> -> vector<10x32xf32>
    %c72 = arith.constant 72 : index
    %c0_9 = arith.constant 0 : index
    %8 = vector.load %arg1[%c72, %c0_9] : memref<184x128xf32, #tpu.memory_space<vmem>>, vector<10x32xf32>
    %9 = arith.addf %7, %8 : vector<10x32xf32>
    %cst_10 = arith.constant dense<0.000000e+00> : vector<10xf32>
    %10 = vector.multi_reduction <add>, %9, %cst_10 [1] : vector<10x32xf32> to vector<10xf32>
    %11 = vector.shape_cast %10 : vector<10xf32> to vector<10x1xf32>
    %12 = arith.mulf %9, %9 : vector<10x32xf32>
    %cst_11 = arith.constant dense<0.000000e+00> : vector<10xf32>
    %13 = vector.multi_reduction <add>, %12, %cst_11 [1] : vector<10x32xf32> to vector<10xf32>
    %14 = vector.shape_cast %13 : vector<10xf32> to vector<10x1xf32>
    %15 = tpu.concatenate %11, %14 in 1 : vector<10x1xf32>, vector<10x1xf32> -> vector<10x2xf32>
    %cst_12 = arith.constant dense<0.000000e+00> : vector<10x2xf32>
    %16 = tpu.matmul %0, %15, %cst_12 {dimension_numbers = #tpu.dot_dimension_numbers<[1], [0], [0], [1], [0, 0, 1, 1], [], []>} : vector<10x10xf32>, vector<10x2xf32>, vector<10x2xf32> -> vector<10x2xf32>
    %17 = vector.extract_strided_slice %16 {offsets = [0, 0], sizes = [10, 1], strides = [1, 1]} : vector<10x2xf32> to vector<10x1xf32>
    %18 = vector.extract_strided_slice %16 {offsets = [0, 1], sizes = [10, 1], strides = [1, 1]} : vector<10x2xf32> to vector<10x1xf32>
    %19 = arith.mulf %17, %17 : vector<10x1xf32>
    %20 = arith.subf %18, %19 : vector<10x1xf32>
    %21 = vector.broadcast %17 : vector<10x1xf32> to vector<10x32xf32>
    %22 = arith.subf %9, %21 : vector<10x32xf32>
    %cst_13 = arith.constant 9.99999974E-6 : f32
    %23 = vector.broadcast %cst_13 : f32 to vector<10x1xf32>
    %24 = arith.addf %20, %23 : vector<10x1xf32>
    %25 = math.rsqrt %24 : vector<10x1xf32>
    %26 = vector.broadcast %25 : vector<10x1xf32> to vector<10x32xf32>
    %27 = arith.mulf %22, %26 : vector<10x32xf32>
    %28 = arith.mulf %27, %3 : vector<10x32xf32>
    %29 = arith.addf %28, %4 : vector<10x32xf32>
    %c192 = arith.constant 192 : index
    %c0_14 = arith.constant 0 : index
    %30 = vector.load %arg2[%c192, %c0_14] : memref<512x128xf32, #tpu.memory_space<vmem>>, vector<32x32xf32>
    %cst_15 = arith.constant dense<0.000000e+00> : vector<10x32xf32>
    %31 = tpu.matmul %29, %30, %cst_15 {dimension_numbers = #tpu.dot_dimension_numbers<[1], [0], [0], [1], [0, 0, 1, 1], [], []>} : vector<10x32xf32>, vector<32x32xf32>, vector<10x32xf32> -> vector<10x32xf32>
    %c128 = arith.constant 128 : index
    %c0_16 = arith.constant 0 : index
    %32 = vector.load %arg1[%c128, %c0_16] : memref<184x128xf32, #tpu.memory_space<vmem>>, vector<1x32xf32>
    %33 = vector.broadcast %32 : vector<1x32xf32> to vector<10x32xf32>
    %34 = arith.addf %31, %33 : vector<10x32xf32>
    %c224 = arith.constant 224 : index
    %c0_17 = arith.constant 0 : index
    %35 = vector.load %arg2[%c224, %c0_17] : memref<512x128xf32, #tpu.memory_space<vmem>>, vector<32x32xf32>
    %cst_18 = arith.constant dense<0.000000e+00> : vector<10x32xf32>
    %36 = tpu.matmul %29, %35, %cst_18 {dimension_numbers = #tpu.dot_dimension_numbers<[1], [0], [0], [1], [0, 0, 1, 1], [], []>} : vector<10x32xf32>, vector<32x32xf32>, vector<10x32xf32> -> vector<10x32xf32>
    %c136 = arith.constant 136 : index
    %c0_19 = arith.constant 0 : index
    %37 = vector.load %arg1[%c136, %c0_19] : memref<184x128xf32, #tpu.memory_space<vmem>>, vector<1x32xf32>
    %38 = vector.broadcast %37 : vector<1x32xf32> to vector<10x32xf32>
    %39 = arith.addf %36, %38 : vector<10x32xf32>
    %c256 = arith.constant 256 : index
    %c0_20 = arith.constant 0 : index
    %40 = vector.load %arg2[%c256, %c0_20] : memref<512x128xf32, #tpu.memory_space<vmem>>, vector<32x32xf32>
    %cst_21 = arith.constant dense<0.000000e+00> : vector<10x32xf32>
    %41 = tpu.matmul %29, %40, %cst_21 {dimension_numbers = #tpu.dot_dimension_numbers<[1], [0], [0], [1], [0, 0, 1, 1], [], []>} : vector<10x32xf32>, vector<32x32xf32>, vector<10x32xf32> -> vector<10x32xf32>
    %c144 = arith.constant 144 : index
    %c0_22 = arith.constant 0 : index
    %42 = vector.load %arg1[%c144, %c0_22] : memref<184x128xf32, #tpu.memory_space<vmem>>, vector<1x32xf32>
    %43 = vector.broadcast %42 : vector<1x32xf32> to vector<10x32xf32>
    %44 = arith.addf %41, %43 : vector<10x32xf32>
    %45 = tpu.concatenate %34, %34, %34, %34 in 0 : vector<10x32xf32>, vector<10x32xf32>, vector<10x32xf32>, vector<10x32xf32> -> vector<40x32xf32>
    %46 = arith.mulf %45, %2 : vector<40x32xf32>
    %47 = tpu.concatenate %44, %44, %44, %44 in 0 : vector<10x32xf32>, vector<10x32xf32>, vector<10x32xf32>, vector<10x32xf32> -> vector<40x32xf32>
    %48 = arith.mulf %47, %2 : vector<40x32xf32>
    %cst_23 = arith.constant dense<0.000000e+00> : vector<10x40xf32>
    %49 = tpu.matmul %39, %46, %cst_23 {dimension_numbers = #tpu.dot_dimension_numbers<[1], [1], [0], [0], [0, 0, 1, 0], [], []>} : vector<10x32xf32>, vector<40x32xf32>, vector<10x40xf32> -> vector<10x40xf32>
    %50 = arith.addf %49, %1 : vector<10x40xf32>
    %cst_24 = arith.constant dense<0xFF800000> : vector<10xf32>
    %51 = vector.multi_reduction <maximumf>, %50, %cst_24 [1] : vector<10x40xf32> to vector<10xf32>
    %52 = vector.shape_cast %51 : vector<10xf32> to vector<10x1xf32>
    %53 = vector.broadcast %52 : vector<10x1xf32> to vector<10x40xf32>
    %54 = arith.subf %50, %53 : vector<10x40xf32>
    %55 = math.exp %54 : vector<10x40xf32>
    %cst_25 = arith.constant dense<0.000000e+00> : vector<10x32xf32>
    %56 = tpu.matmul %55, %48, %cst_25 {dimension_numbers = #tpu.dot_dimension_numbers<[1], [0], [0], [1], [0, 0, 1, 1], [], []>} : vector<10x40xf32>, vector<40x32xf32>, vector<10x32xf32> -> vector<10x32xf32>
    %cst_26 = arith.constant dense<0.000000e+00> : vector<10x32xf32>
    %57 = tpu.matmul %55, %2, %cst_26 {dimension_numbers = #tpu.dot_dimension_numbers<[1], [0], [0], [1], [0, 0, 1, 1], [], []>} : vector<10x40xf32>, vector<40x32xf32>, vector<10x32xf32> -> vector<10x32xf32>
    %58 = tpu.reciprocal %57 {approx = true} : vector<10x32xf32> -> vector<10x32xf32>
    %59 = arith.mulf %56, %58 : vector<10x32xf32>
    %c288 = arith.constant 288 : index
    %c0_27 = arith.constant 0 : index
    %60 = vector.load %arg2[%c288, %c0_27] : memref<512x128xf32, #tpu.memory_space<vmem>>, vector<32x32xf32>
    %cst_28 = arith.constant dense<0.000000e+00> : vector<10x32xf32>
    %61 = tpu.matmul %59, %60, %cst_28 {dimension_numbers = #tpu.dot_dimension_numbers<[1], [0], [0], [1], [0, 0, 1, 1], [], []>} : vector<10x32xf32>, vector<32x32xf32>, vector<10x32xf32> -> vector<10x32xf32>
    %c152 = arith.constant 152 : index
    %c0_29 = arith.constant 0 : index
    %62 = vector.load %arg1[%c152, %c0_29] : memref<184x128xf32, #tpu.memory_space<vmem>>, vector<1x32xf32>
    %63 = vector.broadcast %62 : vector<1x32xf32> to vector<10x32xf32>
    %64 = arith.addf %61, %63 : vector<10x32xf32>
    %65 = arith.addf %9, %64 : vector<10x32xf32>
    %cst_30 = arith.constant dense<0.000000e+00> : vector<10xf32>
    %66 = vector.multi_reduction <add>, %65, %cst_30 [1] : vector<10x32xf32> to vector<10xf32>
    %67 = vector.shape_cast %66 : vector<10xf32> to vector<10x1xf32>
    %68 = arith.mulf %65, %65 : vector<10x32xf32>
    %cst_31 = arith.constant dense<0.000000e+00> : vector<10xf32>
    %69 = vector.multi_reduction <add>, %68, %cst_31 [1] : vector<10x32xf32> to vector<10xf32>
    %70 = vector.shape_cast %69 : vector<10xf32> to vector<10x1xf32>
    %71 = tpu.concatenate %67, %70 in 1 : vector<10x1xf32>, vector<10x1xf32> -> vector<10x2xf32>
    %cst_32 = arith.constant dense<0.000000e+00> : vector<10x2xf32>
    %72 = tpu.matmul %0, %71, %cst_32 {dimension_numbers = #tpu.dot_dimension_numbers<[1], [0], [0], [1], [0, 0, 1, 1], [], []>} : vector<10x10xf32>, vector<10x2xf32>, vector<10x2xf32> -> vector<10x2xf32>
    %73 = vector.extract_strided_slice %72 {offsets = [0, 0], sizes = [10, 1], strides = [1, 1]} : vector<10x2xf32> to vector<10x1xf32>
    %74 = vector.extract_strided_slice %72 {offsets = [0, 1], sizes = [10, 1], strides = [1, 1]} : vector<10x2xf32> to vector<10x1xf32>
    %75 = arith.mulf %73, %73 : vector<10x1xf32>
    %76 = arith.subf %74, %75 : vector<10x1xf32>
    %77 = vector.broadcast %73 : vector<10x1xf32> to vector<10x32xf32>
    %78 = arith.subf %65, %77 : vector<10x32xf32>
    %cst_33 = arith.constant 9.99999974E-6 : f32
    %79 = vector.broadcast %cst_33 : f32 to vector<10x1xf32>
    %80 = arith.addf %76, %79 : vector<10x1xf32>
    %81 = math.rsqrt %80 : vector<10x1xf32>
    %82 = vector.broadcast %81 : vector<10x1xf32> to vector<10x32xf32>
    %83 = arith.mulf %78, %82 : vector<10x32xf32>
    %84 = arith.mulf %83, %3 : vector<10x32xf32>
    %85 = arith.addf %84, %4 : vector<10x32xf32>
    %c320 = arith.constant 320 : index
    %c0_34 = arith.constant 0 : index
    %86 = vector.load %arg2[%c320, %c0_34] : memref<512x128xf32, #tpu.memory_space<vmem>>, vector<32x128xf32>
    %cst_35 = arith.constant dense<0.000000e+00> : vector<10x128xf32>
    %87 = tpu.matmul %85, %86, %cst_35 {dimension_numbers = #tpu.dot_dimension_numbers<[1], [0], [0], [1], [0, 0, 1, 1], [], []>} : vector<10x32xf32>, vector<32x128xf32>, vector<10x128xf32> -> vector<10x128xf32>
    %c160 = arith.constant 160 : index
    %c0_36 = arith.constant 0 : index
    %88 = vector.load %arg1[%c160, %c0_36] : memref<184x128xf32, #tpu.memory_space<vmem>>, vector<1x128xf32>
    %89 = vector.broadcast %88 : vector<1x128xf32> to vector<10x128xf32>
    %90 = arith.addf %87, %89 : vector<10x128xf32>
    %cst_37 = arith.constant 0.000000e+00 : f32
    %91 = vector.broadcast %cst_37 : f32 to vector<10x128xf32>
    %92 = arith.maximumf %90, %91 : vector<10x128xf32>
    %c352 = arith.constant 352 : index
    %c0_38 = arith.constant 0 : index
    %93 = vector.load %arg2[%c352, %c0_38] : memref<512x128xf32, #tpu.memory_space<vmem>>, vector<128x32xf32>
    %cst_39 = arith.constant dense<0.000000e+00> : vector<10x32xf32>
    %94 = tpu.matmul %92, %93, %cst_39 {dimension_numbers = #tpu.dot_dimension_numbers<[1], [0], [0], [1], [0, 0, 1, 1], [], []>} : vector<10x128xf32>, vector<128x32xf32>, vector<10x32xf32> -> vector<10x32xf32>
    %c168 = arith.constant 168 : index
    %c0_40 = arith.constant 0 : index
    %95 = vector.load %arg1[%c168, %c0_40] : memref<184x128xf32, #tpu.memory_space<vmem>>, vector<1x32xf32>
    %96 = vector.broadcast %95 : vector<1x32xf32> to vector<10x32xf32>
    %97 = arith.addf %94, %96 : vector<10x32xf32>
    %cst_41 = arith.constant 0.000000e+00 : f32
    %98 = vector.broadcast %cst_41 : f32 to vector<10x32xf32>
    %99 = arith.maximumf %97, %98 : vector<10x32xf32>
    %100 = arith.addf %65, %99 : vector<10x32xf32>
    %cst_42 = arith.constant dense<0.000000e+00> : vector<10xf32>
    %101 = vector.multi_reduction <add>, %100, %cst_42 [1] : vector<10x32xf32> to vector<10xf32>
    %102 = vector.shape_cast %101 : vector<10xf32> to vector<10x1xf32>
    %103 = arith.mulf %100, %100 : vector<10x32xf32>
    %cst_43 = arith.constant dense<0.000000e+00> : vector<10xf32>
    %104 = vector.multi_reduction <add>, %103, %cst_43 [1] : vector<10x32xf32> to vector<10xf32>
    %105 = vector.shape_cast %104 : vector<10xf32> to vector<10x1xf32>
    %106 = tpu.concatenate %102, %105 in 1 : vector<10x1xf32>, vector<10x1xf32> -> vector<10x2xf32>
    %cst_44 = arith.constant dense<0.000000e+00> : vector<10x2xf32>
    %107 = tpu.matmul %0, %106, %cst_44 {dimension_numbers = #tpu.dot_dimension_numbers<[1], [0], [0], [1], [0, 0, 1, 1], [], []>} : vector<10x10xf32>, vector<10x2xf32>, vector<10x2xf32> -> vector<10x2xf32>
    %108 = vector.extract_strided_slice %107 {offsets = [0, 0], sizes = [10, 1], strides = [1, 1]} : vector<10x2xf32> to vector<10x1xf32>
    %109 = vector.extract_strided_slice %107 {offsets = [0, 1], sizes = [10, 1], strides = [1, 1]} : vector<10x2xf32> to vector<10x1xf32>
    %110 = arith.mulf %108, %108 : vector<10x1xf32>
    %111 = arith.subf %109, %110 : vector<10x1xf32>
    %112 = vector.broadcast %108 : vector<10x1xf32> to vector<10x32xf32>
    %113 = arith.subf %100, %112 : vector<10x32xf32>
    %cst_45 = arith.constant 9.99999974E-6 : f32
    %114 = vector.broadcast %cst_45 : f32 to vector<10x1xf32>
    %115 = arith.addf %111, %114 : vector<10x1xf32>
    %116 = math.rsqrt %115 : vector<10x1xf32>
    %117 = vector.broadcast %116 : vector<10x1xf32> to vector<10x32xf32>
    %118 = arith.mulf %113, %117 : vector<10x32xf32>
    %119 = arith.mulf %118, %3 : vector<10x32xf32>
    %120 = arith.addf %119, %4 : vector<10x32xf32>
    %c192_46 = arith.constant 192 : index
    %c0_47 = arith.constant 0 : index
    %121 = vector.load %arg2[%c192_46, %c0_47] : memref<512x128xf32, #tpu.memory_space<vmem>>, vector<32x32xf32>
    %cst_48 = arith.constant dense<0.000000e+00> : vector<10x32xf32>
    %122 = tpu.matmul %120, %121, %cst_48 {dimension_numbers = #tpu.dot_dimension_numbers<[1], [0], [0], [1], [0, 0, 1, 1], [], []>} : vector<10x32xf32>, vector<32x32xf32>, vector<10x32xf32> -> vector<10x32xf32>
    %c128_49 = arith.constant 128 : index
    %c0_50 = arith.constant 0 : index
    %123 = vector.load %arg1[%c128_49, %c0_50] : memref<184x128xf32, #tpu.memory_space<vmem>>, vector<1x32xf32>
    %124 = vector.broadcast %123 : vector<1x32xf32> to vector<10x32xf32>
    %125 = arith.addf %122, %124 : vector<10x32xf32>
    %c224_51 = arith.constant 224 : index
    %c0_52 = arith.constant 0 : index
    %126 = vector.load %arg2[%c224_51, %c0_52] : memref<512x128xf32, #tpu.memory_space<vmem>>, vector<32x32xf32>
    %cst_53 = arith.constant dense<0.000000e+00> : vector<10x32xf32>
    %127 = tpu.matmul %120, %126, %cst_53 {dimension_numbers = #tpu.dot_dimension_numbers<[1], [0], [0], [1], [0, 0, 1, 1], [], []>} : vector<10x32xf32>, vector<32x32xf32>, vector<10x32xf32> -> vector<10x32xf32>
    %c136_54 = arith.constant 136 : index
    %c0_55 = arith.constant 0 : index
    %128 = vector.load %arg1[%c136_54, %c0_55] : memref<184x128xf32, #tpu.memory_space<vmem>>, vector<1x32xf32>
    %129 = vector.broadcast %128 : vector<1x32xf32> to vector<10x32xf32>
    %130 = arith.addf %127, %129 : vector<10x32xf32>
    %c256_56 = arith.constant 256 : index
    %c0_57 = arith.constant 0 : index
    %131 = vector.load %arg2[%c256_56, %c0_57] : memref<512x128xf32, #tpu.memory_space<vmem>>, vector<32x32xf32>
    %cst_58 = arith.constant dense<0.000000e+00> : vector<10x32xf32>
    %132 = tpu.matmul %120, %131, %cst_58 {dimension_numbers = #tpu.dot_dimension_numbers<[1], [0], [0], [1], [0, 0, 1, 1], [], []>} : vector<10x32xf32>, vector<32x32xf32>, vector<10x32xf32> -> vector<10x32xf32>
    %c144_59 = arith.constant 144 : index
    %c0_60 = arith.constant 0 : index
    %133 = vector.load %arg1[%c144_59, %c0_60] : memref<184x128xf32, #tpu.memory_space<vmem>>, vector<1x32xf32>
    %134 = vector.broadcast %133 : vector<1x32xf32> to vector<10x32xf32>
    %135 = arith.addf %132, %134 : vector<10x32xf32>
    %136 = tpu.concatenate %125, %125, %125, %125 in 0 : vector<10x32xf32>, vector<10x32xf32>, vector<10x32xf32>, vector<10x32xf32> -> vector<40x32xf32>
    %137 = arith.mulf %136, %2 : vector<40x32xf32>
    %138 = tpu.concatenate %135, %135, %135, %135 in 0 : vector<10x32xf32>, vector<10x32xf32>, vector<10x32xf32>, vector<10x32xf32> -> vector<40x32xf32>
    %139 = arith.mulf %138, %2 : vector<40x32xf32>
    %cst_61 = arith.constant dense<0.000000e+00> : vector<10x40xf32>
    %140 = tpu.matmul %130, %137, %cst_61 {dimension_numbers = #tpu.dot_dimension_numbers<[1], [1], [0], [0], [0, 0, 1, 0], [], []>} : vector<10x32xf32>, vector<40x32xf32>, vector<10x40xf32> -> vector<10x40xf32>
    %141 = arith.addf %140, %1 : vector<10x40xf32>
    %cst_62 = arith.constant dense<0xFF800000> : vector<10xf32>
    %142 = vector.multi_reduction <maximumf>, %141, %cst_62 [1] : vector<10x40xf32> to vector<10xf32>
    %143 = vector.shape_cast %142 : vector<10xf32> to vector<10x1xf32>
    %144 = vector.broadcast %143 : vector<10x1xf32> to vector<10x40xf32>
    %145 = arith.subf %141, %144 : vector<10x40xf32>
    %146 = math.exp %145 : vector<10x40xf32>
    %cst_63 = arith.constant dense<0.000000e+00> : vector<10x32xf32>
    %147 = tpu.matmul %146, %139, %cst_63 {dimension_numbers = #tpu.dot_dimension_numbers<[1], [0], [0], [1], [0, 0, 1, 1], [], []>} : vector<10x40xf32>, vector<40x32xf32>, vector<10x32xf32> -> vector<10x32xf32>
    %cst_64 = arith.constant dense<0.000000e+00> : vector<10x32xf32>
    %148 = tpu.matmul %146, %2, %cst_64 {dimension_numbers = #tpu.dot_dimension_numbers<[1], [0], [0], [1], [0, 0, 1, 1], [], []>} : vector<10x40xf32>, vector<40x32xf32>, vector<10x32xf32> -> vector<10x32xf32>
    %149 = tpu.reciprocal %148 {approx = true} : vector<10x32xf32> -> vector<10x32xf32>
    %150 = arith.mulf %147, %149 : vector<10x32xf32>
    %c288_65 = arith.constant 288 : index
    %c0_66 = arith.constant 0 : index
    %151 = vector.load %arg2[%c288_65, %c0_66] : memref<512x128xf32, #tpu.memory_space<vmem>>, vector<32x32xf32>
    %cst_67 = arith.constant dense<0.000000e+00> : vector<10x32xf32>
    %152 = tpu.matmul %150, %151, %cst_67 {dimension_numbers = #tpu.dot_dimension_numbers<[1], [0], [0], [1], [0, 0, 1, 1], [], []>} : vector<10x32xf32>, vector<32x32xf32>, vector<10x32xf32> -> vector<10x32xf32>
    %c152_68 = arith.constant 152 : index
    %c0_69 = arith.constant 0 : index
    %153 = vector.load %arg1[%c152_68, %c0_69] : memref<184x128xf32, #tpu.memory_space<vmem>>, vector<1x32xf32>
    %154 = vector.broadcast %153 : vector<1x32xf32> to vector<10x32xf32>
    %155 = arith.addf %152, %154 : vector<10x32xf32>
    %156 = arith.addf %100, %155 : vector<10x32xf32>
    %cst_70 = arith.constant dense<0.000000e+00> : vector<10xf32>
    %157 = vector.multi_reduction <add>, %156, %cst_70 [1] : vector<10x32xf32> to vector<10xf32>
    %158 = vector.shape_cast %157 : vector<10xf32> to vector<10x1xf32>
    %159 = arith.mulf %156, %156 : vector<10x32xf32>
    %cst_71 = arith.constant dense<0.000000e+00> : vector<10xf32>
    %160 = vector.multi_reduction <add>, %159, %cst_71 [1] : vector<10x32xf32> to vector<10xf32>
    %161 = vector.shape_cast %160 : vector<10xf32> to vector<10x1xf32>
    %162 = tpu.concatenate %158, %161 in 1 : vector<10x1xf32>, vector<10x1xf32> -> vector<10x2xf32>
    %cst_72 = arith.constant dense<0.000000e+00> : vector<10x2xf32>
    %163 = tpu.matmul %0, %162, %cst_72 {dimension_numbers = #tpu.dot_dimension_numbers<[1], [0], [0], [1], [0, 0, 1, 1], [], []>} : vector<10x10xf32>, vector<10x2xf32>, vector<10x2xf32> -> vector<10x2xf32>
    %164 = vector.extract_strided_slice %163 {offsets = [0, 0], sizes = [10, 1], strides = [1, 1]} : vector<10x2xf32> to vector<10x1xf32>
    %165 = vector.extract_strided_slice %163 {offsets = [0, 1], sizes = [10, 1], strides = [1, 1]} : vector<10x2xf32> to vector<10x1xf32>
    %166 = arith.mulf %164, %164 : vector<10x1xf32>
    %167 = arith.subf %165, %166 : vector<10x1xf32>
    %168 = vector.broadcast %164 : vector<10x1xf32> to vector<10x32xf32>
    %169 = arith.subf %156, %168 : vector<10x32xf32>
    %cst_73 = arith.constant 9.99999974E-6 : f32
    %170 = vector.broadcast %cst_73 : f32 to vector<10x1xf32>
    %171 = arith.addf %167, %170 : vector<10x1xf32>
    %172 = math.rsqrt %171 : vector<10x1xf32>
    %173 = vector.broadcast %172 : vector<10x1xf32> to vector<10x32xf32>
    %174 = arith.mulf %169, %173 : vector<10x32xf32>
    %175 = arith.mulf %174, %3 : vector<10x32xf32>
    %176 = arith.addf %175, %4 : vector<10x32xf32>
    %c320_74 = arith.constant 320 : index
    %c0_75 = arith.constant 0 : index
    %177 = vector.load %arg2[%c320_74, %c0_75] : memref<512x128xf32, #tpu.memory_space<vmem>>, vector<32x128xf32>
    %cst_76 = arith.constant dense<0.000000e+00> : vector<10x128xf32>
    %178 = tpu.matmul %176, %177, %cst_76 {dimension_numbers = #tpu.dot_dimension_numbers<[1], [0], [0], [1], [0, 0, 1, 1], [], []>} : vector<10x32xf32>, vector<32x128xf32>, vector<10x128xf32> -> vector<10x128xf32>
    %c160_77 = arith.constant 160 : index
    %c0_78 = arith.constant 0 : index
    %179 = vector.load %arg1[%c160_77, %c0_78] : memref<184x128xf32, #tpu.memory_space<vmem>>, vector<1x128xf32>
    %180 = vector.broadcast %179 : vector<1x128xf32> to vector<10x128xf32>
    %181 = arith.addf %178, %180 : vector<10x128xf32>
    %cst_79 = arith.constant 0.000000e+00 : f32
    %182 = vector.broadcast %cst_79 : f32 to vector<10x128xf32>
    %183 = arith.maximumf %181, %182 : vector<10x128xf32>
    %c352_80 = arith.constant 352 : index
    %c0_81 = arith.constant 0 : index
    %184 = vector.load %arg2[%c352_80, %c0_81] : memref<512x128xf32, #tpu.memory_space<vmem>>, vector<128x32xf32>
    %cst_82 = arith.constant dense<0.000000e+00> : vector<10x32xf32>
    %185 = tpu.matmul %183, %184, %cst_82 {dimension_numbers = #tpu.dot_dimension_numbers<[1], [0], [0], [1], [0, 0, 1, 1], [], []>} : vector<10x128xf32>, vector<128x32xf32>, vector<10x32xf32> -> vector<10x32xf32>
    %c168_83 = arith.constant 168 : index
    %c0_84 = arith.constant 0 : index
    %186 = vector.load %arg1[%c168_83, %c0_84] : memref<184x128xf32, #tpu.memory_space<vmem>>, vector<1x32xf32>
    %187 = vector.broadcast %186 : vector<1x32xf32> to vector<10x32xf32>
    %188 = arith.addf %185, %187 : vector<10x32xf32>
    %cst_85 = arith.constant 0.000000e+00 : f32
    %189 = vector.broadcast %cst_85 : f32 to vector<10x32xf32>
    %190 = arith.maximumf %188, %189 : vector<10x32xf32>
    %191 = arith.addf %156, %190 : vector<10x32xf32>
    %c120 = arith.constant 120 : index
    %c0_86 = arith.constant 0 : index
    %192 = vector.load %arg1[%c120, %c0_86] : memref<184x128xf32, #tpu.memory_space<vmem>>, vector<2x10xf32>
    %cst_87 = arith.constant dense<0.000000e+00> : vector<2x32xf32>
    %193 = tpu.matmul %192, %191, %cst_87 {dimension_numbers = #tpu.dot_dimension_numbers<[1], [0], [0], [1], [0, 0, 1, 1], [], []>} : vector<2x10xf32>, vector<10x32xf32>, vector<2x32xf32> -> vector<2x32xf32>
    %c480 = arith.constant 480 : index
    %c0_88 = arith.constant 0 : index
    %194 = vector.load %arg2[%c480, %c0_88] : memref<512x128xf32, #tpu.memory_space<vmem>>, vector<32x16xf32>
    %cst_89 = arith.constant dense<0.000000e+00> : vector<2x16xf32>
    %195 = tpu.matmul %193, %194, %cst_89 {dimension_numbers = #tpu.dot_dimension_numbers<[1], [0], [0], [1], [0, 0, 1, 1], [], []>} : vector<2x32xf32>, vector<32x16xf32>, vector<2x16xf32> -> vector<2x16xf32>
    %c176 = arith.constant 176 : index
    %c0_90 = arith.constant 0 : index
    %196 = vector.load %arg1[%c176, %c0_90] : memref<184x128xf32, #tpu.memory_space<vmem>>, vector<1x16xf32>
    %197 = vector.broadcast %196 : vector<1x16xf32> to vector<2x16xf32>
    %198 = arith.addf %195, %197 : vector<2x16xf32>
    %c0_91 = arith.constant 0 : index
    %c0_92 = arith.constant 0 : index
    %199 = vector.load %arg3[%c0_91, %c0_92] : memref<2x16xf32, #tpu.memory_space<vmem>>, vector<2x16xf32>
    tpu.vector_store %arg3[%c0_91, %c0_92], %198 {strides = array<i32>} : memref<2x16xf32, #tpu.memory_space<vmem>>, vector<2x16xf32>,
    return
  }
}

</mosaic_0001>

<bundles_post_ra>
// kernel: tile.29
= control target key start
LH: loop header
LB: loop body
LE: loop exit
PB: predicated region body
PF: predicated region fallthrough
CT: control target
= control target key end

     0   :  { %s73_s26 = smov 3  ;;  %s57_s27 = smov 3  ;;  %vm54_vm0 = vcmask 80896   ;;  %vm52_vm1 = vcmask 1047556   ;;  %vm70_vm2 = vcmask 326896   ;;  %vm88_vm3 = vcmask 244896   ;;  %s213_s0 = inlined_call_operand.vmem [shape: f32[10,4,10], index: 0, kind: input, shape index: {}]   ;;  %s214_s1 = inlined_call_operand.vmem [shape: f32[10,40], index: 1, kind: output, shape index: {}]  }
   0x1   :  { %v124_v0 = vld [vmem:[%s213_s0 + $0x24] sm:$0xf]  ;;  %v125_v1 = vld [vmem:[%s213_s0 + $0x20] sm:$0xf]  ;;  %v126_v2 = vld [vmem:[%s213_s0 + $0x1c] sm:$0xf] }
   0x2   :  { %8 = vst [vmem:[#allocation0 + $0x48] sm:$0xf] %v124_v0  ;;  %13 = vst [vmem:[#allocation0 + $0x40] sm:$0xf] %v125_v1  ;;  %v127_v3 = vld [vmem:[%s213_s0 + $0x18] sm:$0xf] }
   0x3   :  { %18 = vst [vmem:[#allocation0 + $0x38] sm:$0xf] %v126_v2  ;;  %23 = vst [vmem:[#allocation0 + $0x30] sm:$0xf] %v127_v3  ;;  %v128_v4 = vld [vmem:[%s213_s0 + $0x14] sm:$0xf] }
   0x4   :  { %v129_v5 = vld [vmem:[%s213_s0 + $0x10] sm:$0xf]  ;;  %v130_v6 = vld [vmem:[%s213_s0 + $0xc] sm:$0xf]  ;;  %28 = vst [vmem:[#allocation0 + $0x28] sm:$0xf] %v128_v4 }
   0x5   :  { %33 = vst [vmem:[#allocation0 + $0x20] sm:$0xf] %v129_v5  ;;  %38 = vst [vmem:[#allocation0 + $0x18] sm:$0xf] %v130_v6  ;;  %v131_v7 = vld [vmem:[%s213_s0 + $0x8] sm:$0xf] }
   0x6   :  { %v132_v8 = vld [vmem:[%s213_s0 + $0x4] sm:$0xf]  ;;  %v48_v9 = vld [vmem:[%s213_s0] sm:$0xf]  ;;  %43 = vst [vmem:[#allocation0 + $0x10] sm:$0xf] %v131_v7 }
   0x7   :  { %47 = vst [vmem:[#allocation0 + $0x8] sm:$0xf] %v132_v8  ;;  %49 = vst [vmem:[#allocation0] sm:$0xf] %v48_v9  ;;  %s91_s0 = smov 3  ;;  %s140_s28 = smov 20  }
   0x8   :  { %s141_s29 = smov 30   ;;  %s109_s30 = smov 3  ;;  %vm106_vm4 = vcmask 162896  }
   0x9   :  { %v92_v10 = vld [vmem:[#allocation0 + $0x42] ss:$8 sm:%s91_s0]   ;;  %v74_v11 = vld [vmem:[#allocation0 + $0x43] ss:$8 sm:%s73_s26]   ;;  %v58_v12 = vld [vmem:[#allocation0 + $0x40] ss:$8 sm:%s57_s27]  }
   0xa   :  { %93 = vrot.lane.b32.xlu1 %v92_v10, %s140_s28  ;;  %75 = vrot.lane.b32.xlu0 %v74_v11, %s141_s29  ;;  %133 = vst.msk [vmem:[%s214_s1 + $0x8] sm:$0x3] %vm54_vm0, %v58_v12   ;;  %v110_v23 = vld [vmem:[#allocation0 + $0x41] ss:$8 sm:%s109_s30]   ;;  %s142_s6 = smov 10  }
   0xc   :  { %v83_v13 = vld [vmem:[#allocation0 + $0x2] ss:$8 sm:$0xf0]   ;;  %v65_v14 = vld [vmem:[#allocation0 + $0x3] ss:$8 sm:$0xf0]  }
   0xd   :  { %v101_v20 = vld [vmem:[#allocation0 + $0x1] ss:$8 sm:$0xf0]   ;;  %v51_v22 = vld [vmem:[#allocation0] ss:$8 sm:$0xf0]  }
   0xe   :  { %v81_v15 = vld [vmem:[#allocation0 + $0x2] ss:$8 sm:$0xf]   ;;  %v63_v16 = vld [vmem:[#allocation0 + $0x3] ss:$8 sm:$0xf]  }
   0xf   :  { %v85_v17 = vsel %vm52_vm1, %v83_v13, %v81_v15  ;;  %v67_v18 = vsel %vm52_vm1, %v65_v14, %v63_v16  ;;  %v99_v19 = vld [vmem:[#allocation0 + $0x1] ss:$8 sm:$0xf]   ;;  %v50_v21 = vld [vmem:[#allocation0] ss:$8 sm:$0xf]  }
  0x10   :  { %86 = vrot.lane.b32.xlu1 %v85_v17, %s140_s28  ;;  %68 = vrot.lane.b32.xlu0 %v67_v18, %s141_s29  ;;  %v103_v24 = vsel %vm52_vm1, %v101_v20, %v99_v19  ;;  %v53_v25 = vsel %vm52_vm1, %v51_v22, %v50_v21 }
  0x11   :  { %55 = vst.msk [vmem:[%s214_s1] sm:$0xff] %vm54_vm0, %v53_v25  }
  0x14   :  { %111 = vrot.lane.b32.xlu1 %v110_v23, %s142_s6  ;;  %104 = vrot.lane.b32.xlu0 %v103_v24, %s142_s6 }
  0x7c   :  { %v94_v26 = vpop.permute.xlu1 %93   ;;  %v76_v27 = vpop.permute.xlu0 %75  }
  0x7d   :  { %134 = vst.msk [vmem:[%s214_s1 + $0x8] sm:$0x3] %vm70_vm2, %v76_v27  }
  0x7e   :  { %135 = vst.msk [vmem:[%s214_s1 + $0x8] sm:$0x3] %vm88_vm3, %v94_v26  }
  0x82   :  { %v87_v28 = vpop.permute.xlu1 %86   ;;  %v69_v29 = vpop.permute.xlu0 %68  }
  0x83   :  { %71 = vst.msk [vmem:[%s214_s1] sm:$0xff] %vm70_vm2, %v69_v29  }
  0x84   :  { %89 = vst.msk [vmem:[%s214_s1] sm:$0xff] %vm88_vm3, %v87_v28  }
  0x86   :  { %v112_v30 = vpop.permute.xlu1 %111   ;;  %v105_v31 = vpop.permute.xlu0 %104  }
  0x87   :  { %136 = vst.msk [vmem:[%s214_s1 + $0x8] sm:$0x3] %vm106_vm4, %v112_v30   ;;  %107 = vst.msk [vmem:[%s214_s1] sm:$0xff] %vm106_vm4, %v105_v31  }

// kernel: tile.24
= control target key start
LH: loop header
LB: loop body
LE: loop exit
PB: predicated region body
PF: predicated region fallthrough
CT: control target
= control target key end

     0   :  { %vm3_vm0 = vcmask 261120   ;;  %s34_s0 = inlined_call_operand.vmem [shape: f32[2,5,32], index: 0, kind: input, shape index: {}]   ;;  %s35_s1 = inlined_call_operand.vmem [shape: f32[10,32], index: 1, kind: output, shape index: {}]  }
   0x1   :  { %v2_v0 = vld [vmem:[%s34_s0] sm:$0x1f]   ;;  %v10_v1 = vld [vmem:[%s34_s0 + $0x8] sm:$0x1f]  }
   0x2   :  { %4 = vst.msk [vmem:[%s35_s1] sm:$0x1f] %vm3_vm0, %v2_v0   ;;  %11 = vst.msk [vmem:[%s35_s1 + $0x5] sm:$0x1f] %vm3_vm0, %v10_v1  }

// kernel: vit_forward.1
= control target key start
LH: loop header
LB: loop body
LE: loop exit
PB: predicated region body
PF: predicated region fallthrough
CT: control target
= control target key end

     0   :  { %v3417_v3 = vmov 0.0|0.0   ;;  %vm58_vm0 = vcmask 523264   ;;  %s4215_s0 = inlined_call_operand.vmem [shape: f32[10,192], index: 0, kind: input, shape index: {}]   ;;  %s4216_s1 = inlined_call_operand.vmem [shape: f32[184,128], index: 1, kind: input, shape index: {}]   ;;  %s4217_s2 = inlined_call_operand.vmem [shape: f32[512,128], index: 2, kind: input, shape index: {}]   ;;  %s4218_s3 = inlined_call_operand.hbm [shape: f32[2,16], index: 3, kind: output, shape index: {}]  }
   0x1   :  { %v32_v0 = vld [vmem:[%s4217_s2] sm:$0xff]  ;;  %v33_v1 = vld [vmem:[%s4217_s2 + $0x8] sm:$0xff]  ;;  %v34_v2 = vld [vmem:[%s4217_s2 + $0x10] sm:$0xff]  ;;  %3068 = vmatprep.subr.bf16.mxu0 %v3417_v3 }
   0x2   :  { %v3069_v4 = vpack.c.bf16 %v33_v1, %v32_v0  ;;  %v35_v5 = vld [vmem:[%s4217_s2 + $0x18] sm:$0xff]  ;;  %v36_v7 = vld [vmem:[%s4217_s2 + $0x20] sm:$0xff]  ;;  %v37_v8 = vld [vmem:[%s4217_s2 + $0x28] sm:$0xff] }
   0x3   :  { %v3072_v6 = vpack.c.bf16 %v35_v5, %v34_v2  ;;  %v3075_v9 = vpack.c.bf16 %v37_v8, %v36_v7  ;;  %v38_v10 = vld [vmem:[%s4217_s2 + $0x30] sm:$0xff]  ;;  %v39_v11 = vld [vmem:[%s4217_s2 + $0x38] sm:$0xff]  ;;  %v29_v12 = vld [vmem:[%s4215_s0 + $0x8] sm:$0xff] }
   0x4   :  { %3070 = vmatpush1.bf16.msra.mxu0 %v3069_v4  ;;  %2536 = vmatprep.mubr.msk.f32.mxu0 %vm58_vm0, %v29_v12 }
   0x5   :  { %3071 = vmatprep.subr.bf16.mxu0 %v3417_v3 }
   0x8   :  { %3073 = vmatpush1.bf16.msra.mxu0 %v3072_v6 }
   0x9   :  { %3074 = vmatprep.subr.bf16.mxu0 %v3417_v3 }
   0xa   :  { %8 = vsyncpa [#allocation3], 0  ;;  %v3078_v13 = vpack.c.bf16 %v39_v11, %v38_v10  ;;  %v40_v14 = vld [vmem:[%s4217_s2 + $0x40] sm:$0xff]  ;;  %v41_v15 = vld [vmem:[%s4217_s2 + $0x48] sm:$0xff]  ;;  %vm140_vm1 = vcmask 261120   ;;  %vm144_vm2 = vcmask 254976  }
   0xb   :  { %v3081_v16 = vpack.c.bf16 %v41_v15, %v40_v14  ;;  %v42_v17 = vld [vmem:[%s4217_s2 + $0x50] sm:$0xff]  ;;  %v43_v18 = vld [vmem:[%s4217_s2 + $0x58] sm:$0xff]  ;;  %v44_v20 = vld [vmem:[%s4217_s2 + $0x60] sm:$0xff]  ;;  %vm159_vm3 = vcmask 80896   ;;  %vm156_vm4 = vcmask 7168   ;;  %vm166_vm5 = vcmask 1041408  }
   0xc   :  { %3076 = vmatpush1.bf16.msra.mxu0 %v3075_v9  ;;  %v3084_v19 = vpack.c.bf16 %v43_v18, %v42_v17  ;;  %v45_v21 = vld [vmem:[%s4217_s2 + $0x68] sm:$0xff]  ;;  %v46_v23 = vld [vmem:[%s4217_s2 + $0x70] sm:$0xff]  ;;  %v47_v24 = vld [vmem:[%s4217_s2 + $0x78] sm:$0xff]  ;;  %vm3418_vm6 = vmmov 1   ;;  %v3419_v1 = vmov 0   ;;  %v3420_v2 = vmov 1  }
   0xd   :  { %3077 = vmatprep.subr.bf16.mxu0 %v3417_v3  ;;  %v3087_v22 = vpack.c.bf16 %v45_v21, %v44_v20  ;;  %v3090_v25 = vpack.c.bf16 %v47_v24, %v46_v23  ;;  %v48_v26 = vld [vmem:[%s4217_s2 + $0x80] sm:$0xff]  ;;  %v49_v27 = vld [vmem:[%s4217_s2 + $0x88] sm:$0xff]  ;;  %v50_v29 = vld [vmem:[%s4217_s2 + $0x90] sm:$0xff]  ;;  %3346 = vset.pattern.permute.xlu1 %v3419_v1  ;;  %s3421_s21 = smov 1   ;;  %vm554_vm8 = vcmask 1043456   ;;  %vm560_vm9 = vcmask 1045504  }
   0xe   :  { %v3093_v28 = vpack.c.bf16 %v49_v27, %v48_v26  ;;  %v51_v30 = vld [vmem:[%s4217_s2 + $0x98] sm:$0xff]  ;;  %v52_v32 = vld [vmem:[%s4217_s2 + $0xa0] sm:$0xff]  ;;  %v53_v33 = vld [vmem:[%s4217_s2 + $0xa8] sm:$0xff]  ;;  %3347 = vset.pattern.permute.xlu0 %v3420_v2  ;;  %vm699_vm11 = vcmask 320512   ;;  %vm695_vm12 = vcmask 326656   ;;  %vm3422_vm13 = vmmov 0  }
   0xf   :  { %v3096_v31 = vpack.c.bf16 %v51_v30, %v50_v29  ;;  %v3099_v34 = vpack.c.bf16 %v53_v33, %v52_v32  ;;  %v54_v35 = vld [vmem:[%s4217_s2 + $0xb0] sm:$0xff]  ;;  %v55_v36 = vld [vmem:[%s4217_s2 + $0xb8] sm:$0xff]  ;;  %v28_v38 = vld [vmem:[%s4215_s0] sm:$0xff]  ;;  %s3424_s16 = smov [#allocation2]   ;;  %vm2520_vm14 = vcmask 123904  }
  0x10   :  { %3079 = vmatpush1.bf16.msra.mxu0 %v3078_v13  ;;  %v3102_v37 = vpack.c.bf16 %v55_v36, %v54_v35  ;;  %v31_v39 = vld [vmem:[%s4215_s0 + $0x18] sm:$0x3]  ;;  %v30_v40 = vld [vmem:[%s4215_s0 + $0x10] sm:$0x3]  ;;  %v56_v41 = vld [vmem:[%s4216_s1 + $0x48] sm:$0xff]  ;;  %s2528_s17 = sshll.u32 %s3424_s16, 4  ;;  %s2529_s17 = int_to_ptr.vmem [resolvable:$true] %s2528_s17 }
  0x11   :  { %3080 = vmatprep.subr.bf16.mxu0 %v3417_v3  ;;  %v57_v45 = vld [vmem:[%s4216_s1 + $0x50] sm:$0x3]  ;;  %v3566_v55 = vld [vmem:[%s4216_s1] sm:$0xff]  ;;  %vm3573_vm7 = vmpackc.low %vm166_vm5, %vm3418_vm6  ;;  %p3398_p1 = scmp.lt.s32.totalorder %s2529_s17, %s2529_s17 }
  0x12   :  { %2768 = vmatprep.mubr.msk.f32.mxu1 %vm159_vm3, %v3566_v55  ;;  %v3584_v0 = vld [vmem:[%s4216_s1 + $0x8] sm:$0x3]  ;;  %v289_v8 = vld [vmem:[%s4217_s2 + $0xc0] sm:$0xff]  ;;  %v292_v20 = vld [vmem:[%s4217_s2 + $0xd8] sm:$0xff] }
  0x13   :  { %v290_v9 = vld [vmem:[%s4217_s2 + $0xc8] sm:$0xff]  ;;  %v3628_v29 = vld [vmem:[%s4216_s1 + $0x60] sm:$0x3]  ;;  %v3633_v32 = vld [vmem:[%s4216_s1 + $0x58] sm:$0xff] }
  0x14   :  { %3082 = vmatpush1.bf16.msra.mxu0 %v3081_v16  ;;  %v3598_v10 = vpack.c.bf16 %v290_v9, %v289_v8  ;;  %v380_v23 = vld [vmem:[%s4217_s2 + $0xe8] sm:$0xff]  ;;  %v3711_v8 = vld [vmem:[%s4216_s1 + $0x38] sm:$0xff]  ;;  %vm3728_vm10 = vmpackc.low %vm140_vm1, %vm140_vm1 }
  0x15   :  { %3083 = vmatprep.subr.bf16.mxu0 %v3417_v3  ;;  %v3639_v36 = vld [vmem:[%s4216_s1 + $0x68] sm:$0xff] }
  0x18   :  { %3085 = vmatpush1.bf16.msra.mxu0 %v3084_v19  ;;  %v291_v19 = vld [vmem:[%s4217_s2 + $0xd0] sm:$0xff] }
  0x19   :  { %3086 = vmatprep.subr.bf16.mxu0 %v3417_v3  ;;  %v3609_v21 = vpack.c.bf16 %v292_v20, %v291_v19 }
  0x1c   :  { %3088 = vmatpush1.bf16.msra.mxu0 %v3087_v22  ;;  %v379_v22 = vld [vmem:[%s4217_s2 + $0xe0] sm:$0xff] }
  0x1d   :  { %3089 = vmatprep.subr.bf16.mxu0 %v3417_v3  ;;  %v3620_v24 = vpack.c.bf16 %v380_v23, %v379_v22 }
  0x20   :  { %3091 = vmatpush1.bf16.msra.mxu0 %v3090_v25 }
  0x21   :  { %3092 = vmatprep.subr.bf16.mxu0 %v3417_v3 }
  0x24   :  { %3094 = vmatpush1.bf16.msra.mxu0 %v3093_v28 }
  0x25   :  { %3095 = vmatprep.subr.bf16.mxu0 %v3417_v3 }
  0x28   :  { %3097 = vmatpush1.bf16.msra.mxu0 %v3096_v31 }
  0x29   :  { %3098 = vmatprep.subr.bf16.mxu0 %v3417_v3 }
  0x2c   :  { %3100 = vmatpush1.bf16.msra.mxu0 %v3099_v34 }
  0x2d   :  { %3101 = vmatprep.subr.bf16.mxu0 %v3417_v3 }
  0x30   :  { %3103 = vmatpush1.bf16.msra.mxu0 %v3102_v37  ;;  %v3644_v37 = vld [vmem:[%s4216_s1 + $0x70] sm:$0x3] }
  0x33   :  { %130 = vmatmul.mubr.f32.vlgmr.msra.gmra.mrb[0].mxu0 %v28_v38 }
  0x34   :  { %2537 = vmatprep.mubr.msk.f32.mxu0 %vm58_vm0, %v31_v39  ;;  %v381_v39 = vld [vmem:[%s4217_s2 + $0xf0] sm:$0xff] }
  0x37   :  { %135 = vmatmul.mubr.f32.gmra.mrb[2].mxu0 %v30_v40  ;;  %v382_v40 = vld [vmem:[%s4217_s2 + $0xf8] sm:$0xff] }
 0x106   :  { %v131_v42 = vpop.f32.mrb[0].mxu0 }
 0x107   :  { %v3546_v43 = vadd.f32 %v131_v42, %v56_v41  ;;  %v133_v44 = vpop.f32.mrb[1].mxu0 }
 0x108   :  { %v3655_v44 = vpack.c.bf16 %v382_v40, %v381_v39 }
 0x109   :  { %v141_v46 = vsel %vm140_vm1, %v3546_v43, 0.0  ;;  %v148_v47 = vmul.f32 %v3546_v43, %v3546_v43 }
 0x10a   :  { %v136_v48 = vpop.f32.mrb[2].mxu0  ;;  %142 = vadd.xlane.f32.xlu0 %v141_v46  ;;  %v464_v46 = vld [vmem:[%s4217_s2 + $0x108] sm:$0xff] }
 0x10b   :  { %v3555_v49 = vadd.f32 %v136_v48, %v57_v45  ;;  %v138_v50 = vpop.f32.mrb[3].mxu0  ;;  %v150_v51 = vsel %vm140_vm1, %v148_v47, 0.0  ;;  %v463_v45 = vld [vmem:[%s4217_s2 + $0x100] sm:$0xff]  ;;  %v465_v48 = vld [vmem:[%s4217_s2 + $0x110] sm:$0xff] }
 0x10c   :  { %151 = vadd.xlane.f32.xlu1 %v150_v51  ;;  %v3668_v47 = vpack.c.bf16 %v464_v46, %v463_v45  ;;  %v466_v50 = vld [vmem:[%s4217_s2 + $0x118] sm:$0xff] }
 0x10d   :  { %v145_v52 = vsel %vm144_vm2, %v3555_v49, 0.0  ;;  %v149_v53 = vmul.f32 %v3555_v49, %v3555_v49  ;;  %v3678_v51 = vpack.c.bf16 %v466_v50, %v465_v48 }
 0x10e   :  { %146 = vadd.xlane.f32.xlu0 %v145_v52  ;;  %v3689_v52 = vld [vmem:[%s4216_s1 + $0x80] ss:$0 sm:$0xff] }
 0x10f   :  { %v153_v54 = vsel %vm144_vm2, %v149_v53, 0.0 }
 0x110   :  { %154 = vadd.xlane.f32.xlu1 %v153_v54 }
 0x197   :  { %v143_v56 = vpop.xlane.xlu0 %142 }
 0x199   :  { %v152_v57 = vpop.xlane.xlu1 %151 }
 0x19a   :  { %v157_v60 = vsel %vm156_vm4, %v143_v56, %v152_v57 }
 0x19b   :  { %v147_v58 = vpop.xlane.xlu0 %146 }
 0x19d   :  { %v155_v59 = vpop.xlane.xlu1 %154 }
 0x19e   :  { %v158_v61 = vsel %vm156_vm4, %v147_v58, %v155_v59 }
 0x19f   :  { %v3104_v63 = vpack.c.bf16 %v158_v61, %v157_v60  ;;  %v3696_v61 = vld [vmem:[%s4216_s1 + $0x20] sm:$0xff] }
 0x1a1   :  { %3106 = vmatprep.subr.msk.bf16.mxu1 %vm3573_vm7, %v3104_v63 }
 0x1a2   :  { %3109 = vmatpush3.bf16.msk.msra.mxu1 %vm3573_vm7, %v3104_v63 }
 0x1a3   :  { %3111 = vmatprep.subr.bf16.mxu1 %v3598_v10 }
 0x1a5   :  { %2769 = vmatmul.mubr.msk.f32.vlgmr.msra.gmra.mrb[0].mxu1 %vm159_vm3, %v3584_v0 }
 0x1a6   :  { %3113 = vmatpush3.bf16.msra.mxu1 %v3598_v10 }
 0x1a7   :  { %3115 = vmatprep.subr.bf16.mxu1 %v3609_v21 }
 0x1aa   :  { %3117 = vmatpush3.bf16.msra.mxu1 %v3609_v21 }
 0x1ab   :  { %3119 = vmatprep.subr.bf16.mxu1 %v3620_v24 }
 0x278   :  { %v2770_v4 = vpop.f32.mrb[0].mxu1 }
 0x279   :  { %v246_v5 = vmul.f32 %v2770_v4, %v2770_v4  ;;  %v236_v6 = vpop.f32.mrb[1].mxu1 }
 0x27a   :  { %v245_v7 = vmul.f32 %v236_v6, %v236_v6 }
 0x27b   :  { %251 = vrot.lane.b32.xlu1 %v246_v5, %s3421_s21 }
 0x27c   :  { %249 = vrot.lane.b32.xlu0 %v245_v7, %s3421_s21  ;;  %v3706_v7 = vld [vmem:[%s4216_s1 + $0x30] sm:$0xff] }
 0x27f   :  { %259 = vperm.xlu1 %3346, %v236_v6  }
 0x283   :  { %264 = vperm.xlu1 %3346, %v2770_v4  }
 0x287   :  { %3348 = vset.pattern.permute.xlu1 %v3420_v2 }
 0x2ed   :  { %v252_v11 = vpop.permute.xlu1 %251 }
 0x2ee   :  { %v256_v12 = vsub.f32 %v2770_v4, %v252_v11  ;;  %v250_v13 = vpop.permute.xlu0 %249 }
 0x2ef   :  { %v255_v14 = vsub.f32 %v236_v6, %v250_v13  ;;  %v3701_v6 = vld [vmem:[%s4216_s1 + $0x28] sm:$0xff] }
 0x2f0   :  { %v270_v15 = vadd.f32 1e-05, %v256_v12 }
 0x2f1   :  { %v269_v16 = vadd.f32 1e-05, %v255_v14 }
 0x2f2   :  { %3355 = vrsqrt.f32 %v270_v15  ;;  %v3721_v15 = vld [vmem:[%s4216_s1 + $0x88] ss:$0 sm:$0xff] }
 0x2f3   :  { %3357 = vrsqrt.f32 %v269_v16 }
 0x2fc   :  { %v3356_v17 = vpop.eup %3355 }
 0x2fd   :  { %v3358_v18 = vpop.eup %3357  ;;  %280 = vperm.xlu1 %3348, %v3356_v17  }
 0x2fe   :  { %275 = vperm.xlu0 %3347, %v3358_v18   ;;  %v260_v25 = vpop.permute.xlu1 %259 }
 0x2ff   :  { %v267_v28 = vsub.f32 %v3546_v43, %v260_v25 }
 0x301   :  { %3349 = vset.pattern.permute.xlu1 %v3419_v1 }
 0x302   :  { %v265_v26 = vpop.permute.xlu1 %264 }
 0x303   :  { %v268_v27 = vsub.f32 %v3555_v49, %v265_v26 }
 0x37c   :  { %v281_v30 = vpop.permute.xlu1 %280 }
 0x37d   :  { %v284_v31 = vmul.f32 %v281_v30, %v268_v27  ;;  %v276_v33 = vpop.permute.xlu0 %275  ;;  %v3745_v30 = vld [vmem:[%s4216_s1 + $0x90] ss:$0 sm:$0xff] }
 0x37e   :  { %v283_v34 = vmul.f32 %v276_v33, %v267_v28  ;;  %v3750_v33 = vld [vmem:[%s4216_s1 + $0x40] sm:$0xff] }
 0x37f   :  { %v286_v35 = vmul.f32 %v284_v31, %v3628_v29 }
 0x380   :  { %v285_v38 = vmul.f32 %v283_v34, %v3633_v32 }
 0x381   :  { %v288_v42 = vadd.f32 %v286_v35, %v3644_v37 }
 0x382   :  { %v287_v41 = vadd.f32 %v285_v38, %v3639_v36 }
 0x384   :  { %2779 = vmatprep.mubr.msk.f32.mxu1 %vm140_vm1, %v287_v41 }
 0x385   :  { %2780 = vmatmul.mubr.msk.f32.vlgmr.msra.gmra.mrb[2].mxu1 %vm140_vm1, %v288_v42 }
 0x386   :  { %3121 = vmatpush3.bf16.msra.mxu1 %v3620_v24  ;;  %2790 = vmatprep.mubr.msk.f32.mxu1 %vm140_vm1, %v287_v41 }
 0x387   :  { %3123 = vmatprep.subr.bf16.mxu1 %v3655_v44 }
 0x38a   :  { %3125 = vmatpush3.bf16.msra.mxu1 %v3655_v44 }
 0x38b   :  { %3127 = vmatprep.subr.bf16.mxu1 %v3668_v47 }
 0x38d   :  { %2791 = vmatmul.mubr.msk.f32.vlgmr.msra.gmra.mrb[4].mxu1 %vm140_vm1, %v288_v42 }
 0x38e   :  { %3129 = vmatpush3.bf16.msra.mxu1 %v3668_v47  ;;  %2801 = vmatprep.mubr.msk.f32.mxu1 %vm140_vm1, %v287_v41 }
 0x38f   :  { %3131 = vmatprep.subr.bf16.mxu1 %v3678_v51 }
 0x392   :  { %3133 = vmatpush3.bf16.msra.mxu1 %v3678_v51 }
 0x395   :  { %2802 = vmatmul.mubr.msk.f32.vlgmr.msra.gmra.mrb[6].mxu1 %vm140_vm1, %v288_v42 }
 0x458   :  { %v2781_v53 = vpop.f32.mrb[2].mxu1 }
 0x459   :  { %v376_v54 = vadd.f32 %v2781_v53, %v3689_v52  ;;  %v370_v56 = vpop.f32.mrb[3].mxu1 }
 0x45a   :  { %v371_v57 = vadd.f32 %v3689_v52, %v370_v56 }
 0x45b   :  { %v550_v58 = vrot.slane %v376_v54, 6  ;;  %v556_v59 = vrot.slane %v376_v54, 4  ;;  %v562_v60 = vrot.slane %v376_v54, 2 }
 0x45c   :  { %v549_v63 = vrot.slane %v371_v57, 6  ;;  %v555_v4 = vrot.slane %v371_v57, 4  ;;  %v561_v5 = vrot.slane %v371_v57, 2  ;;  %v569_v14 = vmul.f32 %v371_v57, %v3696_v61 }
 0x45e   :  { %v566_v9 = vsel %vm166_vm5, %v376_v54, %v549_v63  ;;  %v551_v11 = vsel %vm166_vm5, %v549_v63, %v550_v58  ;;  %v557_v12 = vsel %vm554_vm8, %v555_v4, %v556_v59  ;;  %v563_v13 = vsel %vm560_vm9, %v561_v5, %v562_v60 }
 0x45f   :  { %v570_v16 = vmul.f32 %v566_v9, %v3701_v6  ;;  %v567_v17 = vsel %vm554_vm8, %v551_v11, %v555_v4  ;;  %v568_v18 = vsel %vm560_vm9, %v557_v12, %v561_v5  ;;  %v573_v42 = vmul.f32 %v563_v13, %v3750_v33  ;;  %v3775_v13 = vld [vmem:[%s4216_s1 + $0x18] sm:$0x3] }
 0x460   :  { %v2792_v19 = vpop.f32.mrb[4].mxu1  ;;  %v571_v22 = vmul.f32 %v567_v17, %v3706_v7  ;;  %v572_v23 = vmul.f32 %v568_v18, %v3711_v8 }
 0x461   :  { %v454_v25 = vpop.f32.mrb[5].mxu1  ;;  %v3134_v26 = vpack.c.bf16 %v570_v16, %v569_v14  ;;  %v460_v11 = vadd.f32 %v2792_v19, %v3721_v15  ;;  %v3780_v14 = vld [vmem:[%s4216_s1 + $0x10] sm:$0xff] }
 0x462   :  { %v455_v27 = vadd.f32 %v3721_v15, %v454_v25  ;;  %v3140_v28 = vpack.c.bf16 %v572_v23, %v571_v22  ;;  %v3788_v25 = vpack.c.bf16 %v3701_v6, %v3696_v61 }
 0x463   :  { %3136 = vmatprep.subr.msk.bf16.mxu1 %vm3728_vm10, %v3134_v26 }
 0x464   :  { %2814 = vmatprep.mubr.msk.f32.mxu1 %vm140_vm1, %v455_v27  ;;  %3139 = vmatpush3.bf16.xpose.msk.msra.mxu1 %vm3728_vm10, %v3134_v26  ;;  %v3792_v26 = vpack.c.bf16 %v3711_v8, %v3706_v7 }
 0x465   :  { %3142 = vmatprep.subr.msk.bf16.mxu1 %vm3728_vm10, %v3140_v28 }
 0x468   :  { %v2803_v31 = vpop.f32.mrb[6].mxu1 }
 0x469   :  { %v544_v34 = vadd.f32 %v2803_v31, %v3745_v30  ;;  %v538_v35 = vpop.f32.mrb[7].mxu1 }
 0x46a   :  { %v539_v38 = vadd.f32 %v3745_v30, %v538_v35 }
 0x46b   :  { %v577_v39 = vrot.slane %v544_v34, 6  ;;  %v582_v40 = vrot.slane %v544_v34, 4  ;;  %v587_v41 = vrot.slane %v544_v34, 2 }
 0x46c   :  { %v576_v45 = vrot.slane %v539_v38, 6  ;;  %v581_v46 = vrot.slane %v539_v38, 4  ;;  %v586_v48 = vrot.slane %v539_v38, 2  ;;  %3145 = vmatpush3.bf16.xpose.msk.msra.mxu1 %vm3728_vm10, %v3140_v28  ;;  %v594_v57 = vmul.f32 %v539_v38, %v3696_v61 }
 0x46d   :  { %2812 = vmatprep.subr.msk.mxu1 %vm140_vm1, %v573_v42 }
 0x46e   :  { %v591_v50 = vsel %vm166_vm5, %v544_v34, %v576_v45  ;;  %v578_v53 = vsel %vm166_vm5, %v576_v45, %v577_v39  ;;  %v583_v54 = vsel %vm554_vm8, %v581_v46, %v582_v40  ;;  %v588_v56 = vsel %vm560_vm9, %v586_v48, %v587_v41  ;;  %v869_v41 = vld [vmem:[%s4217_s2 + $0x120] sm:$0xff] }
 0x46f   :  { %v595_v58 = vmul.f32 %v591_v50, %v3701_v6  ;;  %v592_v59 = vsel %vm554_vm8, %v578_v53, %v581_v46  ;;  %v593_v60 = vsel %vm560_vm9, %v583_v54, %v586_v48  ;;  %v598_v12 = vmul.f32 %v588_v56, %v3750_v33  ;;  %v871_v46 = vld [vmem:[%s4217_s2 + $0x130] sm:$0xff]  ;;  %v872_v48 = vld [vmem:[%s4217_s2 + $0x138] sm:$0xff] }
 0x470   :  { %v596_v63 = vmul.f32 %v592_v59, %v3706_v7  ;;  %v597_v4 = vmul.f32 %v593_v60, %v3711_v8  ;;  %v3820_v50 = vpack.c.bf16 %v872_v48, %v871_v46 }
 0x471   :  { %v3146_v5 = vpack.c.bf16 %v595_v58, %v594_v57 }
 0x472   :  { %v3150_v9 = vpack.c.bf16 %v597_v4, %v596_v63  ;;  %v3831_v4 = vld [vmem:[%s4216_s1 + $0x98] ss:$0 sm:$0xff] }
 0x473   :  { %3147 = vmatprep.subr.bf16.mxu0 %v3146_v5 }
 0x474   :  { %3149 = vmatpush3.bf16.msra.mxu0 %v3146_v5  ;;  %2813 = vmatpush3.xpose.msk.msra.mxu1 %vm140_vm1, %v573_v42  ;;  %v870_v42 = vld [vmem:[%s4217_s2 + $0x128] sm:$0xff] }
 0x475   :  { %3151 = vmatprep.subr.bf16.mxu0 %v3150_v9  ;;  %3155 = vmatprep.subr.bf16.mxu1 %v3788_v25  ;;  %v3810_v45 = vpack.c.bf16 %v870_v42, %v869_v41 }
 0x477   :  { %2815 = vmatmul.mubr.msk.f32.vlgmr.msra.gmra.mrb[8].mxu1 %vm140_vm1, %v460_v11 }
 0x478   :  { %3153 = vmatpush3.bf16.msra.mxu0 %v3150_v9  ;;  %3157 = vmatpush3.bf16.msra.mxu1 %v3788_v25 }
 0x479   :  { %2825 = vmatprep.subr.mxu0 %v598_v12  ;;  %3159 = vmatprep.subr.bf16.mxu1 %v3792_v26 }
 0x47c   :  { %2826 = vmatpush3.msra.mxu0 %v598_v12  ;;  %3161 = vmatpush3.bf16.msra.mxu1 %v3792_v26 }
 0x47d   :  { %2838 = vmatprep.subr.mxu1 %v3750_v33 }
 0x480   :  { %2839 = vmatpush3.msra.mxu1 %v3750_v33 }
 0x481   :  { %3163 = vmatprep.subr.bf16.mxu1 %v3810_v45 }
 0x54a   :  { %v2816_v16 = vpop.f32.mrb[8].mxu1 }
 0x54b   :  { %v692_v17 = vadd.f32 %v2816_v16, %v3775_v13  ;;  %v686_v18 = vpop.f32.mrb[9].mxu1 }
 0x54c   :  { %v687_v19 = vadd.f32 %v686_v18, %v3780_v14 }
 0x54d   :  { %v700_v22 = vsel %vm699_vm11, %v692_v17, -inf }
 0x54e   :  { %701 = vmax.xlane.f32.xlu0 %v700_v22  ;;  %v696_v23 = vsel %vm695_vm12, %v687_v19, -inf }
 0x54f   :  { %697 = vmax.xlane.f32.xlu1 %v696_v23 }
 0x5db   :  { %v702_v27 = vpop.xlane.xlu0 %701 }
 0x5dc   :  { %v704_v28 = vsub.f32 %v692_v17, %v702_v27  ;;  %v698_v31 = vpop.xlane.xlu1 %697 }
 0x5dd   :  { %v703_v34 = vsub.f32 %v687_v19, %v698_v31 }
 0x5de   :  { %v707_v35 = vmul.f32 1.442695, %v704_v28 }
 0x5df   :  { %v705_v38 = vmul.f32 1.442695, %v703_v34 }
 0x5e1   :  { %3359 = vpow2.f32 %v705_v38 }
 0x5e2   :  { %3361 = vpow2.f32 %v707_v35 }
 0x5eb   :  { %v3360_v39 = vpop.eup %3359 }
 0x5ec   :  { %v3362_v40 = vpop.eup %3361  ;;  %2827 = vmatprep.mubr.msk.f32.mxu0 %vm695_vm12, %v3360_v39  ;;  %2840 = vmatprep.mubr.msk.f32.mxu1 %vm695_vm12, %v3360_v39 }
 0x5ed   :  { %2828 = vmatmul.mubr.msk.f32.vlgmr.msra.gmra.mrb[4].mxu0 %vm695_vm12, %v3362_v40  ;;  %2841 = vmatmul.mubr.msk.f32.vlgmr.msra.gmra.mrb[10].mxu1 %vm695_vm12, %v3362_v40 }
 0x5ee   :  { %3165 = vmatpush3.bf16.msra.mxu1 %v3810_v45 }
 0x5ef   :  { %3167 = vmatprep.subr.bf16.mxu1 %v3820_v50 }
 0x5f2   :  { %3169 = vmatpush3.bf16.msra.mxu1 %v3820_v50 }
 0x6c0   :  { %v2829_v53 = vpop.f32.mrb[4].mxu0  ;;  %v2842_v54 = vpop.f32.mrb[10].mxu1 }
 0x6c1   :  { %3363 = vrcp.f32 %v2842_v54  ;;  %v781_v56 = vpop.f32.mrb[5].mxu0  ;;  %v856_v57 = vpop.f32.mrb[11].mxu1 }
 0x6c2   :  { %3365 = vrcp.f32 %v856_v57 }
 0x6cb   :  { %v3364_v58 = vpop.eup %3363 }
 0x6cc   :  { %v3366_v59 = vpop.eup %3365  ;;  %v868_v60 = vmul.f32 %v3364_v58, %v2829_v53 }
 0x6cd   :  { %v867_v63 = vmul.f32 %v3366_v59, %v781_v56  ;;  %v1099_v59 = vld [vmem:[%s4217_s2 + $0x140] sm:$0xff] }
 0x6cf   :  { %2851 = vmatprep.mubr.msk.f32.mxu1 %vm140_vm1, %v867_v63 }
 0x6d0   :  { %2852 = vmatmul.mubr.msk.f32.vlgmr.msra.gmra.mrb[12].mxu1 %vm140_vm1, %v868_v60  ;;  %v1100_v60 = vld [vmem:[%s4217_s2 + $0x148] sm:$0xff] }
 0x6d1   :  { %2858 = vmatprep.mubr.msk.f32.mxu1 %vm159_vm3, %v3566_v55 }
 0x7a3   :  { %v2853_v5 = vpop.f32.mrb[12].mxu1 }
 0x7a4   :  { %v956_v9 = vadd.f32 %v2853_v5, %v3831_v4  ;;  %v950_v11 = vpop.f32.mrb[13].mxu1  ;;  %v3868_v5 = vpack.c.bf16 %v1100_v60, %v1099_v59 }
 0x7a5   :  { %v951_v12 = vadd.f32 %v3831_v4, %v950_v11  ;;  %v1101_v11 = vld [vmem:[%s4217_s2 + $0x150] sm:$0xff] }
 0x7a6   :  { %v3836_v16 = vadd.f32 %v956_v9, %v3555_v49 }
 0x7a7   :  { %v3839_v17 = vadd.f32 %v951_v12, %v3546_v43  ;;  %v1102_v12 = vld [vmem:[%s4217_s2 + $0x158] sm:$0xff] }
 0x7a8   :  { %v964_v18 = vsel %vm144_vm2, %v3836_v16, 0.0  ;;  %v968_v49 = vmul.f32 %v3836_v16, %v3836_v16 }
 0x7a9   :  { %965 = vadd.xlane.f32.xlu0 %v964_v18  ;;  %v967_v19 = vmul.f32 %v3839_v17, %v3839_v17  ;;  %v961_v23 = vsel %vm140_vm1, %v3839_v17, 0.0  ;;  %v3878_v18 = vpack.c.bf16 %v1102_v12, %v1101_v11 }
 0x7aa   :  { %v972_v43 = vsel %vm144_vm2, %v968_v49, 0.0 }
 0x7ab   :  { %v969_v22 = vsel %vm140_vm1, %v967_v19, 0.0  ;;  %v1191_v19 = vld [vmem:[%s4217_s2 + $0x160] sm:$0xff] }
 0x7ac   :  { %970 = vadd.xlane.f32.xlu1 %v969_v22  ;;  %v1192_v22 = vld [vmem:[%s4217_s2 + $0x168] sm:$0xff] }
 0x7ad   :  { %962 = vadd.xlane.f32.xlu0 %v961_v23  ;;  %v1193_v23 = vld [vmem:[%s4217_s2 + $0x170] sm:$0xff]  ;;  %v3892_v49 = vpack.c.bf16 %v1192_v22, %v1191_v19 }
 0x7af   :  { %3185 = vmatprep.subr.bf16.mxu0 %v3892_v49 }
 0x7b0   :  { %3187 = vmatpush3.bf16.msra.mxu0 %v3892_v49 }
 0x7b1   :  { %973 = vadd.xlane.f32.xlu0 %v972_v43  ;;  %v1194_v43 = vld [vmem:[%s4217_s2 + $0x178] sm:$0xff] }
 0x836   :  { %v966_v27 = vpop.xlane.xlu0 %965 }
 0x839   :  { %v971_v31 = vpop.xlane.xlu1 %970 }
 0x83a   :  { %v963_v28 = vpop.xlane.xlu0 %962 }
 0x83b   :  { %v975_v35 = vsel %vm156_vm4, %v963_v28, %v971_v31  ;;  %v1195_v28 = vld [vmem:[%s4217_s2 + $0x180] sm:$0xff]  ;;  %v1196_v31 = vld [vmem:[%s4217_s2 + $0x188] sm:$0xff] }
 0x83e   :  { %v974_v34 = vpop.xlane.xlu0 %973 }
 0x83f   :  { %v976_v38 = vsel %vm156_vm4, %v966_v27, %v974_v34  ;;  %v3897_v27 = vpack.c.bf16 %v1194_v43, %v1193_v23  ;;  %v3908_v34 = vpack.c.bf16 %v1196_v31, %v1195_v28  ;;  %v1205_v31 = vld [vmem:[%s4217_s2 + $0x1d0] sm:$0xff] }
 0x840   :  { %v3170_v39 = vpack.c.bf16 %v976_v38, %v975_v35  ;;  %v1197_v35 = vld [vmem:[%s4217_s2 + $0x190] sm:$0xff]  ;;  %v1198_v38 = vld [vmem:[%s4217_s2 + $0x198] sm:$0xff] }
 0x841   :  { %3189 = vmatprep.subr.bf16.mxu0 %v3897_v27 }
 0x842   :  { %3172 = vmatprep.subr.msk.bf16.mxu1 %vm3573_vm7, %v3170_v39  ;;  %3191 = vmatpush3.bf16.msra.mxu0 %v3897_v27 }
 0x843   :  { %3175 = vmatpush3.bf16.msk.msra.mxu1 %vm3573_vm7, %v3170_v39  ;;  %3193 = vmatprep.subr.bf16.mxu0 %v3908_v34  ;;  %v3918_v39 = vpack.c.bf16 %v1198_v38, %v1197_v35  ;;  %v1206_v35 = vld [vmem:[%s4217_s2 + $0x1d8] sm:$0xff] }
 0x844   :  { %3177 = vmatprep.subr.bf16.mxu1 %v3868_v5  ;;  %v3969_v38 = vpack.c.bf16 %v1206_v35, %v1205_v31 }
 0x846   :  { %2859 = vmatmul.mubr.msk.f32.vlgmr.msra.gmra.mrb[14].mxu1 %vm159_vm3, %v3584_v0  ;;  %3195 = vmatpush3.bf16.msra.mxu0 %v3908_v34 }
 0x847   :  { %3179 = vmatpush3.bf16.msra.mxu1 %v3868_v5  ;;  %3197 = vmatprep.subr.bf16.mxu0 %v3918_v39 }
 0x848   :  { %3181 = vmatprep.subr.bf16.mxu1 %v3878_v18 }
 0x84a   :  { %3199 = vmatpush3.bf16.msra.mxu0 %v3918_v39 }
 0x84b   :  { %3183 = vmatpush3.bf16.msra.mxu1 %v3878_v18 }
 0x919   :  { %v2860_v40 = vpop.f32.mrb[14].mxu1 }
 0x91a   :  { %v1056_v41 = vmul.f32 %v2860_v40, %v2860_v40  ;;  %v1046_v42 = vpop.f32.mrb[15].mxu1 }
 0x91b   :  { %v1055_v46 = vmul.f32 %v1046_v42, %v1046_v42 }
 0x91c   :  { %1061 = vrot.lane.b32.xlu0 %v1056_v41, %s3421_s21  ;;  %v1200_v41 = vld [vmem:[%s4217_s2 + $0x1a8] sm:$0xff] }
 0x91d   :  { %1059 = vrot.lane.b32.xlu1 %v1055_v46, %s3421_s21  ;;  %v1201_v46 = vld [vmem:[%s4217_s2 + $0x1b0] sm:$0xff] }
 0x921   :  { %1069 = vperm.xlu1 %3349, %v1046_v42  }
 0x925   :  { %1074 = vperm.xlu1 %3349, %v2860_v40  }
 0x929   :  { %3350 = vset.pattern.permute.xlu1 %v3420_v2 }
 0x98e   :  { %v1062_v48 = vpop.permute.xlu0 %1061 }
 0x98f   :  { %v1066_v53 = vsub.f32 %v2860_v40, %v1062_v48  ;;  %v1060_v54 = vpop.permute.xlu1 %1059  ;;  %v1199_v40 = vld [vmem:[%s4217_s2 + $0x1a0] sm:$0xff]  ;;  %v1202_v48 = vld [vmem:[%s4217_s2 + $0x1b8] sm:$0xff] }
 0x990   :  { %v1065_v56 = vsub.f32 %v1046_v42, %v1060_v54  ;;  %v3928_v42 = vpack.c.bf16 %v1200_v41, %v1199_v40  ;;  %v1203_v54 = vld [vmem:[%s4217_s2 + $0x1c0] sm:$0xff] }
 0x991   :  { %v1080_v57 = vadd.f32 1e-05, %v1066_v53  ;;  %v3938_v53 = vpack.c.bf16 %v1202_v48, %v1201_v46  ;;  %v3976_v40 = vld [vmem:[%s4216_s1 + $0xa0] ss:$0 sm:$0xff] }
 0x992   :  { %v1079_v58 = vadd.f32 1e-05, %v1065_v56  ;;  %3201 = vmatprep.subr.bf16.mxu0 %v3928_v42  ;;  %v1204_v56 = vld [vmem:[%s4217_s2 + $0x1c8] sm:$0xff] }
 0x993   :  { %3367 = vrsqrt.f32 %v1080_v57  ;;  %3203 = vmatpush3.bf16.msra.mxu0 %v3928_v42  ;;  %v3948_v57 = vpack.c.bf16 %v1204_v56, %v1203_v54 }
 0x994   :  { %3369 = vrsqrt.f32 %v1079_v58  ;;  %3205 = vmatprep.subr.bf16.mxu0 %v3938_v53 }
 0x997   :  { %3207 = vmatpush3.bf16.msra.mxu0 %v3938_v53 }
 0x998   :  { %3209 = vmatprep.subr.bf16.mxu0 %v3948_v57 }
 0x99b   :  { %3211 = vmatpush3.bf16.msra.mxu0 %v3948_v57 }
 0x99c   :  { %3213 = vmatprep.subr.bf16.mxu0 %v3969_v38 }
 0x99d   :  { %v3368_v63 = vpop.eup %3367 }
 0x99e   :  { %v3370_v9 = vpop.eup %3369  ;;  %1090 = vperm.xlu0 %3347, %v3368_v63  }
 0x99f   :  { %1085 = vperm.xlu1 %3350, %v3370_v9   ;;  %3215 = vmatpush3.bf16.msra.mxu0 %v3969_v38 }
 0x9a0   :  { %v1070_v58 = vpop.permute.xlu1 %1069 }
 0x9a1   :  { %v1077_v63 = vsub.f32 %v3839_v17, %v1070_v58  ;;  %v3983_v58 = vld [vmem:[%s4216_s1 + $0xa8] ss:$0 sm:$0xff] }
 0x9a3   :  { %3351 = vset.pattern.permute.xlu1 %v3419_v1 }
 0x9a4   :  { %v1075_v59 = vpop.permute.xlu1 %1074 }
 0x9a5   :  { %v1078_v60 = vsub.f32 %v3836_v16, %v1075_v59 }
 0xa1d   :  { %v1091_v9 = vpop.permute.xlu0 %1090 }
 0xa1e   :  { %v1094_v11 = vmul.f32 %v1091_v9, %v1078_v60  ;;  %v1086_v12 = vpop.permute.xlu1 %1085 }
 0xa1f   :  { %v1093_v19 = vmul.f32 %v1086_v12, %v1077_v63 }
 0xa20   :  { %v1096_v22 = vmul.f32 %v1094_v11, %v3628_v29 }
 0xa21   :  { %v1095_v23 = vmul.f32 %v1093_v19, %v3633_v32 }
 0xa22   :  { %v1098_v28 = vadd.f32 %v1096_v22, %v3644_v37 }
 0xa23   :  { %v1097_v43 = vadd.f32 %v1095_v23, %v3639_v36 }
 0xa25   :  { %2869 = vmatprep.mubr.msk.f32.mxu1 %vm140_vm1, %v1097_v43 }
 0xa26   :  { %2870 = vmatmul.mubr.msk.f32.vlgmr.msra.gmra.mrb[16].mxu1 %vm140_vm1, %v1098_v28 }
 0xa27   :  { %2911 = vmatprep.mubr.msk.f32.mxu1 %vm159_vm3, %v3566_v55 }
 0xaf9   :  { %v2871_v55 = vpop.f32.mrb[16].mxu1 }
 0xafa   :  { %v1186_v41 = vadd.f32 %v2871_v55, %v3976_v40  ;;  %v1180_v46 = vpop.f32.mrb[17].mxu1 }
 0xafb   :  { %v1181_v48 = vadd.f32 %v3976_v40, %v1180_v46 }
 0xafc   :  { %v1190_v56 = vmax.f32 %v1186_v41, 0.0 }
 0xafd   :  { %v1189_v54 = vmax.f32 %v1181_v48, 0.0 }
 0xaff   :  { %2904 = vmatprep.mubr.f32.mxu0 %v1189_v54 }
 0xb00   :  { %2905 = vmatmul.mubr.f32.vlgmr.msra.gmra.mrb[6].mxu0 %v1190_v56 }
 0xbd3   :  { %v2906_v59 = vpop.f32.mrb[6].mxu0 }
 0xbd4   :  { %v1284_v60 = vadd.f32 %v2906_v59, %v3983_v58  ;;  %v1278_v63 = vpop.f32.mrb[7].mxu0 }
 0xbd5   :  { %v1279_v9 = vadd.f32 %v3983_v58, %v1278_v63 }
 0xbd6   :  { %v1288_v11 = vmax.f32 %v1284_v60, 0.0 }
 0xbd7   :  { %v1287_v12 = vmax.f32 %v1279_v9, 0.0 }
 0xbd8   :  { %v3988_v19 = vadd.f32 %v1288_v11, %v3836_v16 }
 0xbd9   :  { %v3991_v22 = vadd.f32 %v1287_v12, %v3839_v17 }
 0xbda   :  { %v1294_v23 = vsel %vm144_vm2, %v3988_v19, 0.0  ;;  %v1298_v16 = vmul.f32 %v3988_v19, %v3988_v19 }
 0xbdb   :  { %1295 = vadd.xlane.f32.xlu0 %v1294_v23  ;;  %v1291_v43 = vsel %vm140_vm1, %v3991_v22, 0.0  ;;  %v1297_v28 = vmul.f32 %v3991_v22, %v3991_v22 }
 0xbdc   :  { %1292 = vadd.xlane.f32.xlu1 %v1291_v43  ;;  %v1302_v17 = vsel %vm144_vm2, %v1298_v16, 0.0 }
 0xbdd   :  { %v1299_v31 = vsel %vm140_vm1, %v1297_v28, 0.0 }
 0xbdf   :  { %1300 = vadd.xlane.f32.xlu0 %v1299_v31 }
 0xbe3   :  { %1303 = vadd.xlane.f32.xlu0 %v1302_v17 }
 0xc68   :  { %v1296_v35 = vpop.xlane.xlu0 %1295 }
 0xc69   :  { %v1293_v41 = vpop.xlane.xlu1 %1292 }
 0xc6c   :  { %v1301_v55 = vpop.xlane.xlu0 %1300 }
 0xc6d   :  { %v1305_v48 = vsel %vm156_vm4, %v1293_v41, %v1301_v55 }
 0xc70   :  { %v1304_v46 = vpop.xlane.xlu0 %1303 }
 0xc71   :  { %v1306_v54 = vsel %vm156_vm4, %v1296_v35, %v1304_v46 }
 0xc72   :  { %v3216_v56 = vpack.c.bf16 %v1306_v54, %v1305_v48 }
 0xc74   :  { %3218 = vmatprep.subr.msk.bf16.mxu1 %vm3573_vm7, %v3216_v56 }
 0xc75   :  { %3221 = vmatpush3.bf16.msk.msra.mxu1 %vm3573_vm7, %v3216_v56 }
 0xc76   :  { %3223 = vmatprep.subr.bf16.mxu1 %v3598_v10 }
 0xc78   :  { %2912 = vmatmul.mubr.msk.f32.vlgmr.msra.gmra.mrb[18].mxu1 %vm159_vm3, %v3584_v0 }
 0xc79   :  { %3225 = vmatpush3.bf16.msra.mxu1 %v3598_v10 }
 0xc7a   :  { %3227 = vmatprep.subr.bf16.mxu1 %v3609_v21 }
 0xc7d   :  { %3229 = vmatpush3.bf16.msra.mxu1 %v3609_v21 }
 0xc7e   :  { %3231 = vmatprep.subr.bf16.mxu1 %v3620_v24 }
 0xd4b   :  { %v2913_v59 = vpop.f32.mrb[18].mxu1 }
 0xd4c   :  { %v1386_v60 = vmul.f32 %v2913_v59, %v2913_v59  ;;  %v1376_v63 = vpop.f32.mrb[19].mxu1 }
 0xd4d   :  { %v1385_v9 = vmul.f32 %v1376_v63, %v1376_v63 }
 0xd4e   :  { %1391 = vrot.lane.b32.xlu0 %v1386_v60, %s3421_s21 }
 0xd4f   :  { %1389 = vrot.lane.b32.xlu1 %v1385_v9, %s3421_s21 }
 0xd53   :  { %1399 = vperm.xlu1 %3351, %v1376_v63  }
 0xd57   :  { %1404 = vperm.xlu1 %3351, %v2913_v59  }
 0xd5b   :  { %3352 = vset.pattern.permute.xlu1 %v3420_v2 }
 0xdc0   :  { %v1392_v0 = vpop.permute.xlu0 %1391 }
 0xdc1   :  { %v1396_v10 = vsub.f32 %v2913_v59, %v1392_v0  ;;  %v1390_v11 = vpop.permute.xlu1 %1389 }
 0xdc2   :  { %v1395_v12 = vsub.f32 %v1376_v63, %v1390_v11 }
 0xdc3   :  { %v1410_v23 = vadd.f32 1e-05, %v1396_v10 }
 0xdc4   :  { %v1409_v21 = vadd.f32 1e-05, %v1395_v12 }
 0xdc5   :  { %3371 = vrsqrt.f32 %v1410_v23 }
 0xdc6   :  { %3373 = vrsqrt.f32 %v1409_v21 }
 0xdcf   :  { %v3372_v43 = vpop.eup %3371 }
 0xdd0   :  { %v3374_v28 = vpop.eup %3373  ;;  %1420 = vperm.xlu0 %3347, %v3372_v43  }
 0xdd1   :  { %1415 = vperm.xlu1 %3352, %v3374_v28  }
 0xdd2   :  { %v1400_v31 = vpop.permute.xlu1 %1399 }
 0xdd3   :  { %v1407_v35 = vsub.f32 %v3991_v22, %v1400_v31 }
 0xdd5   :  { %3353 = vset.pattern.permute.xlu1 %v3419_v1 }
 0xdd6   :  { %v1405_v16 = vpop.permute.xlu1 %1404 }
 0xdd7   :  { %v1408_v17 = vsub.f32 %v3988_v19, %v1405_v16 }
 0xe4f   :  { %v1421_v55 = vpop.permute.xlu0 %1420 }
 0xe50   :  { %v1424_v41 = vmul.f32 %v1421_v55, %v1408_v17  ;;  %v1416_v46 = vpop.permute.xlu1 %1415 }
 0xe51   :  { %v1423_v48 = vmul.f32 %v1416_v46, %v1407_v35 }
 0xe52   :  { %v1426_v54 = vmul.f32 %v1424_v41, %v3628_v29 }
 0xe53   :  { %v1425_v56 = vmul.f32 %v1423_v48, %v3633_v32 }
 0xe54   :  { %v1428_v60 = vadd.f32 %v1426_v54, %v3644_v37 }
 0xe55   :  { %v1427_v59 = vadd.f32 %v1425_v56, %v3639_v36 }
 0xe57   :  { %2922 = vmatprep.mubr.msk.f32.mxu1 %vm140_vm1, %v1427_v59 }
 0xe58   :  { %2923 = vmatmul.mubr.msk.f32.vlgmr.msra.gmra.mrb[20].mxu1 %vm140_vm1, %v1428_v60 }
 0xe59   :  { %3233 = vmatpush3.bf16.msra.mxu1 %v3620_v24  ;;  %2933 = vmatprep.mubr.msk.f32.mxu1 %vm140_vm1, %v1427_v59 }
 0xe5a   :  { %3235 = vmatprep.subr.bf16.mxu1 %v3655_v44 }
 0xe5d   :  { %3237 = vmatpush3.bf16.msra.mxu1 %v3655_v44 }
 0xe5e   :  { %3239 = vmatprep.subr.bf16.mxu1 %v3668_v47 }
 0xe60   :  { %2934 = vmatmul.mubr.msk.f32.vlgmr.msra.gmra.mrb[22].mxu1 %vm140_vm1, %v1428_v60 }
 0xe61   :  { %3241 = vmatpush3.bf16.msra.mxu1 %v3668_v47  ;;  %2944 = vmatprep.mubr.msk.f32.mxu1 %vm140_vm1, %v1427_v59 }
 0xe62   :  { %3243 = vmatprep.subr.bf16.mxu1 %v3678_v51 }
 0xe65   :  { %3245 = vmatpush3.bf16.msra.mxu1 %v3678_v51 }
 0xe68   :  { %2945 = vmatmul.mubr.msk.f32.vlgmr.msra.gmra.mrb[24].mxu1 %vm140_vm1, %v1428_v60 }
 0xf2b   :  { %v2924_v1 = vpop.f32.mrb[20].mxu1 }
 0xf2c   :  { %v1507_v24 = vadd.f32 %v2924_v1, %v3689_v52  ;;  %v1501_v29 = vpop.f32.mrb[21].mxu1 }
 0xf2d   :  { %v1502_v32 = vadd.f32 %v3689_v52, %v1501_v29 }
 0xf2e   :  { %v1663_v36 = vrot.slane %v1507_v24, 6  ;;  %v1668_v37 = vrot.slane %v1507_v24, 4  ;;  %v1673_v44 = vrot.slane %v1507_v24, 2 }
 0xf2f   :  { %v1662_v63 = vrot.slane %v1502_v32, 6  ;;  %v1667_v9 = vrot.slane %v1502_v32, 4  ;;  %v1672_v47 = vrot.slane %v1502_v32, 2  ;;  %v1680_v12 = vmul.f32 %v1502_v32, %v3696_v61 }
 0xf31   :  { %v1677_v0 = vsel %vm166_vm5, %v1507_v24, %v1662_v63  ;;  %v1664_v10 = vsel %vm166_vm5, %v1662_v63, %v1663_v36  ;;  %v1669_v51 = vsel %vm554_vm8, %v1667_v9, %v1668_v37  ;;  %v1674_v11 = vsel %vm560_vm9, %v1672_v47, %v1673_v44 }
 0xf32   :  { %v1681_v23 = vmul.f32 %v1677_v0, %v3701_v6  ;;  %v1678_v52 = vsel %vm554_vm8, %v1664_v10, %v1667_v9  ;;  %v1679_v21 = vsel %vm560_vm9, %v1669_v51, %v1672_v47  ;;  %v1684_v1 = vmul.f32 %v1674_v11, %v3750_v33 }
 0xf33   :  { %v2935_v43 = vpop.f32.mrb[22].mxu1  ;;  %v1682_v28 = vmul.f32 %v1678_v52, %v3706_v7  ;;  %v1683_v31 = vmul.f32 %v1679_v21, %v3711_v8 }
 0xf34   :  { %v1576_v16 = vpop.f32.mrb[23].mxu1  ;;  %v3246_v17 = vpack.c.bf16 %v1681_v23, %v1680_v12  ;;  %v1582_v12 = vadd.f32 %v2935_v43, %v3721_v15 }
 0xf35   :  { %v1577_v35 = vadd.f32 %v3721_v15, %v1576_v16  ;;  %v3252_v55 = vpack.c.bf16 %v1683_v31, %v1682_v28 }
 0xf36   :  { %3248 = vmatprep.subr.msk.bf16.mxu0 %vm3728_vm10, %v3246_v17 }
 0xf37   :  { %2957 = vmatprep.mubr.msk.f32.mxu0 %vm140_vm1, %v1577_v35  ;;  %3251 = vmatpush3.bf16.xpose.msk.msra.mxu0 %vm3728_vm10, %v3246_v17 }
 0xf38   :  { %3254 = vmatprep.subr.msk.bf16.mxu0 %vm3728_vm10, %v3252_v55 }
 0xf3b   :  { %v2946_v41 = vpop.f32.mrb[24].mxu1 }
 0xf3c   :  { %v1657_v46 = vadd.f32 %v2946_v41, %v3745_v30  ;;  %v1651_v48 = vpop.f32.mrb[25].mxu1 }
 0xf3d   :  { %v1652_v54 = vadd.f32 %v3745_v30, %v1651_v48 }
 0xf3e   :  { %v1688_v56 = vrot.slane %v1657_v46, 6  ;;  %v1693_v59 = vrot.slane %v1657_v46, 4  ;;  %v1698_v60 = vrot.slane %v1657_v46, 2 }
 0xf3f   :  { %v1687_v24 = vrot.slane %v1652_v54, 6  ;;  %v1692_v29 = vrot.slane %v1652_v54, 4  ;;  %v1697_v32 = vrot.slane %v1652_v54, 2  ;;  %3257 = vmatpush3.bf16.xpose.msk.msra.mxu0 %vm3728_vm10, %v3252_v55  ;;  %v1705_v63 = vmul.f32 %v1652_v54, %v3696_v61 }
 0xf40   :  { %2955 = vmatprep.subr.msk.mxu0 %vm140_vm1, %v1684_v1 }
 0xf41   :  { %v1702_v36 = vsel %vm166_vm5, %v1657_v46, %v1687_v24  ;;  %v1689_v37 = vsel %vm166_vm5, %v1687_v24, %v1688_v56  ;;  %v1694_v44 = vsel %vm554_vm8, %v1692_v29, %v1693_v59  ;;  %v1699_v30 = vsel %vm560_vm9, %v1697_v32, %v1698_v60 }
 0xf42   :  { %v1706_v9 = vmul.f32 %v1702_v36, %v3701_v6  ;;  %v1703_v47 = vsel %vm554_vm8, %v1689_v37, %v1692_v29  ;;  %v1704_v0 = vsel %vm560_vm9, %v1694_v44, %v1697_v32  ;;  %v1709_v61 = vmul.f32 %v1699_v30, %v3750_v33  ;;  %v3388_v32 = vld [vmem:[%s4216_s1 + $0x8] sm:$0x3] }
 0xf43   :  { %v1707_v20 = vmul.f32 %v1703_v47, %v3706_v7  ;;  %v1708_v10 = vmul.f32 %v1704_v0, %v3711_v8 }
 0xf44   :  { %v3258_v51 = vpack.c.bf16 %v1706_v9, %v1705_v63 }
 0xf45   :  { %v3262_v11 = vpack.c.bf16 %v1708_v10, %v1707_v20 }
 0xf46   :  { %3259 = vmatprep.subr.bf16.mxu1 %v3258_v51 }
 0xf47   :  { %3261 = vmatpush3.bf16.msra.mxu1 %v3258_v51  ;;  %2956 = vmatpush3.xpose.msk.msra.mxu0 %vm140_vm1, %v1684_v1 }
 0xf48   :  { %3263 = vmatprep.subr.bf16.mxu1 %v3262_v11  ;;  %3275 = vmatprep.subr.bf16.mxu0 %v3810_v45 }
 0xf4a   :  { %2958 = vmatmul.mubr.msk.f32.vlgmr.msra.gmra.mrb[8].mxu0 %vm140_vm1, %v1582_v12 }
 0xf4b   :  { %3265 = vmatpush3.bf16.msra.mxu1 %v3262_v11  ;;  %3277 = vmatpush3.bf16.msra.mxu0 %v3810_v45 }
 0xf4c   :  { %2968 = vmatprep.subr.mxu1 %v1709_v61  ;;  %3279 = vmatprep.subr.bf16.mxu0 %v3820_v50 }
 0xf4f   :  { %2969 = vmatpush3.msra.mxu1 %v1709_v61  ;;  %3281 = vmatpush3.bf16.msra.mxu0 %v3820_v50 }
 0xf50   :  { %3267 = vmatprep.subr.bf16.mxu1 %v3788_v25  ;;  %3297 = vmatprep.subr.bf16.mxu0 %v3892_v49 }
0x101d   :  { %v2959_v6 = vpop.f32.mrb[8].mxu0 }
0x101e   :  { %v1803_v7 = vadd.f32 %v2959_v6, %v3775_v13  ;;  %v1797_v8 = vpop.f32.mrb[9].mxu0  ;;  %v3387_v13 = vld [vmem:[%s4216_s1] sm:$0xff] }
0x101f   :  { %v1798_v15 = vadd.f32 %v1797_v8, %v3780_v14 }
0x1020   :  { %v1809_v23 = vsel %vm699_vm11, %v1803_v7, -inf }
0x1021   :  { %1810 = vmax.xlane.f32.xlu0 %v1809_v23  ;;  %v1806_v45 = vsel %vm695_vm12, %v1798_v15, -inf }
0x1022   :  { %1807 = vmax.xlane.f32.xlu1 %v1806_v45  ;;  %v3390_v45 = vld [vmem:[%s4216_s1 + $0x58] sm:$0xff] }
0x10ae   :  { %v1811_v52 = vpop.xlane.xlu0 %1810 }
0x10af   :  { %v1813_v21 = vsub.f32 %v1803_v7, %v1811_v52  ;;  %v1808_v43 = vpop.xlane.xlu1 %1807 }
0x10b0   :  { %v1812_v50 = vsub.f32 %v1798_v15, %v1808_v43  ;;  %v3389_v15 = vld [vmem:[%s4216_s1 + $0x60] sm:$0x3] }
0x10b1   :  { %v1816_v28 = vmul.f32 1.442695, %v1813_v21  ;;  %v3391_v21 = vld [vmem:[%s4216_s1 + $0x68] sm:$0xff] }
0x10b2   :  { %v1814_v31 = vmul.f32 1.442695, %v1812_v50  ;;  %v3392_v50 = vld [vmem:[%s4216_s1 + $0x70] sm:$0x3] }
0x10b4   :  { %3375 = vpow2.f32 %v1814_v31 }
0x10b5   :  { %3377 = vpow2.f32 %v1816_v28 }
0x10be   :  { %v3376_v16 = vpop.eup %3375 }
0x10bf   :  { %v3378_v17 = vpop.eup %3377  ;;  %2970 = vmatprep.mubr.msk.f32.mxu1 %vm695_vm12, %v3376_v16 }
0x10c0   :  { %2971 = vmatmul.mubr.msk.f32.vlgmr.msra.gmra.mrb[26].mxu1 %vm695_vm12, %v3378_v17 }
0x10c1   :  { %3269 = vmatpush3.bf16.msra.mxu1 %v3788_v25  ;;  %2983 = vmatprep.mubr.msk.f32.mxu1 %vm695_vm12, %v3376_v16 }
0x10c2   :  { %3271 = vmatprep.subr.bf16.mxu1 %v3792_v26 }
0x10c5   :  { %3273 = vmatpush3.bf16.msra.mxu1 %v3792_v26 }
0x10c6   :  { %2981 = vmatprep.subr.mxu1 %v3750_v33 }
0x10c9   :  { %2982 = vmatpush3.msra.mxu1 %v3750_v33 }
0x10ca   :  { %2984 = vmatmul.mubr.msk.f32.vlgmr.msra.gmra.mrb[28].mxu1 %vm695_vm12, %v3378_v17 }
0x10cb   :  { %3001 = vmatprep.mubr.msk.f32.mxu1 %vm159_vm3, %v3387_v13 }
0x1193   :  { %v2972_v14 = vpop.f32.mrb[26].mxu1 }
0x1194   :  { %v1890_v25 = vpop.f32.mrb[27].mxu1 }
0x119d   :  { %v2985_v35 = vpop.f32.mrb[28].mxu1 }
0x119e   :  { %3379 = vrcp.f32 %v2985_v35  ;;  %v1965_v55 = vpop.f32.mrb[29].mxu1  ;;  %v3423_v35 = vmov 0.0  }
0x119f   :  { %3381 = vrcp.f32 %v1965_v55 }
0x11a8   :  { %v3380_v41 = vpop.eup %3379 }
0x11a9   :  { %v3382_v26 = vpop.eup %3381  ;;  %v1977_v46 = vmul.f32 %v3380_v41, %v2972_v14 }
0x11aa   :  { %v1976_v48 = vmul.f32 %v3382_v26, %v1890_v25 }
0x11ac   :  { %2994 = vmatprep.mubr.msk.f32.mxu0 %vm140_vm1, %v1976_v48 }
0x11ad   :  { %2995 = vmatmul.mubr.msk.f32.vlgmr.msra.gmra.mrb[10].mxu0 %vm140_vm1, %v1977_v46 }
0x11ae   :  { %3299 = vmatpush3.bf16.msra.mxu0 %v3892_v49 }
0x11af   :  { %3301 = vmatprep.subr.bf16.mxu0 %v3897_v27 }
0x11b2   :  { %3303 = vmatpush3.bf16.msra.mxu0 %v3897_v27 }
0x11b3   :  { %3305 = vmatprep.subr.bf16.mxu0 %v3908_v34 }
0x11b6   :  { %3307 = vmatpush3.bf16.msra.mxu0 %v3908_v34 }
0x11b7   :  { %3309 = vmatprep.subr.bf16.mxu0 %v3918_v39 }
0x11ba   :  { %3311 = vmatpush3.bf16.msra.mxu0 %v3918_v39 }
0x11bb   :  { %3313 = vmatprep.subr.bf16.mxu0 %v3928_v42 }
0x11be   :  { %3315 = vmatpush3.bf16.msra.mxu0 %v3928_v42 }
0x11bf   :  { %3317 = vmatprep.subr.bf16.mxu0 %v3938_v53 }
0x11c2   :  { %3319 = vmatpush3.bf16.msra.mxu0 %v3938_v53 }
0x11c3   :  { %3321 = vmatprep.subr.bf16.mxu0 %v3948_v57 }
0x11c6   :  { %3323 = vmatpush3.bf16.msra.mxu0 %v3948_v57 }
0x11c7   :  { %3325 = vmatprep.subr.bf16.mxu0 %v3969_v38 }
0x11ca   :  { %3327 = vmatpush3.bf16.msra.mxu0 %v3969_v38 }
0x1280   :  { %v2996_v33 = vpop.f32.mrb[10].mxu0 }
0x1281   :  { %v2056_v49 = vadd.f32 %v2996_v33, %v3831_v4  ;;  %v2050_v27 = vpop.f32.mrb[11].mxu0 }
0x1282   :  { %v2051_v34 = vadd.f32 %v3831_v4, %v2050_v27  ;;  %v2438_v27 = vld [vmem:[%s4217_s2 + $0x1e0] sm:$0xff] }
0x1283   :  { %v4122_v39 = vadd.f32 %v2056_v49, %v3988_v19 }
0x1284   :  { %v4125_v42 = vadd.f32 %v2051_v34, %v3991_v22  ;;  %v2439_v34 = vld [vmem:[%s4217_s2 + $0x1e8] sm:$0xff] }
0x1285   :  { %v2064_v53 = vsel %vm144_vm2, %v4122_v39, 0.0  ;;  %v2068_v4 = vmul.f32 %v4122_v39, %v4122_v39 }
0x1286   :  { %2065 = vadd.xlane.f32.xlu0 %v2064_v53  ;;  %v2067_v57 = vmul.f32 %v4125_v42, %v4125_v42  ;;  %v2061_v54 = vsel %vm140_vm1, %v4125_v42, 0.0 }
0x1287   :  { %v2072_v19 = vsel %vm144_vm2, %v2068_v4, 0.0  ;;  %v2600_v4 = vld [vmem:[%s4216_s1 + $0xb0] ss:$0 sm:$0xff] }
0x1288   :  { %v2069_v38 = vsel %vm140_vm1, %v2067_v57, 0.0  ;;  %v3333_v57 = vpack.c.bf16 %v2439_v34, %v2438_v27 }
0x1289   :  { %2070 = vadd.xlane.f32.xlu1 %v2069_v38 }
0x128a   :  { %2062 = vadd.xlane.f32.xlu0 %v2061_v54 }
0x128e   :  { %2073 = vadd.xlane.f32.xlu0 %v2072_v19 }
0x1313   :  { %v2066_v22 = vpop.xlane.xlu0 %2065 }
0x1316   :  { %v2071_v59 = vpop.xlane.xlu1 %2070 }
0x1317   :  { %v2063_v56 = vpop.xlane.xlu0 %2062 }
0x1318   :  { %v2075_v1 = vsel %vm156_vm4, %v2063_v56, %v2071_v59 }
0x131b   :  { %v2074_v60 = vpop.xlane.xlu0 %2073 }
0x131c   :  { %v2076_v24 = vsel %vm156_vm4, %v2066_v22, %v2074_v60 }
0x131d   :  { %v3282_v29 = vpack.c.bf16 %v2076_v24, %v2075_v1 }
0x131f   :  { %3284 = vmatprep.subr.msk.bf16.mxu1 %vm3573_vm7, %v3282_v29 }
0x1320   :  { %3287 = vmatpush3.bf16.msk.msra.mxu1 %vm3573_vm7, %v3282_v29 }
0x1321   :  { %3289 = vmatprep.subr.bf16.mxu1 %v3868_v5 }
0x1323   :  { %3002 = vmatmul.mubr.msk.f32.vlgmr.msra.gmra.mrb[30].mxu1 %vm159_vm3, %v3388_v32 }
0x1324   :  { %3291 = vmatpush3.bf16.msra.mxu1 %v3868_v5 }
0x1325   :  { %3293 = vmatprep.subr.bf16.mxu1 %v3878_v18 }
0x1328   :  { %3295 = vmatpush3.bf16.msra.mxu1 %v3878_v18 }
0x1329   :  { %3328 = vmatprep.subr.bf16.mxu1 %v3417_v3 }
0x13f6   :  { %v3003_v36 = vpop.f32.mrb[30].mxu1 }
0x13f7   :  { %v2156_v37 = vmul.f32 %v3003_v36, %v3003_v36  ;;  %v2146_v44 = vpop.f32.mrb[31].mxu1 }
0x13f8   :  { %v2155_v30 = vmul.f32 %v2146_v44, %v2146_v44 }
0x13f9   :  { %2161 = vrot.lane.b32.xlu0 %v2156_v37, %s3421_s21 }
0x13fa   :  { %2159 = vrot.lane.b32.xlu1 %v2155_v30, %s3421_s21 }
0x13fe   :  { %2169 = vperm.xlu1 %3353, %v2146_v44  }
0x1402   :  { %2174 = vperm.xlu1 %3353, %v3003_v36  }
0x1406   :  { %3354 = vset.pattern.permute.xlu1 %v3420_v2 }
0x146b   :  { %v2162_v63 = vpop.permute.xlu0 %2161 }
0x146c   :  { %v2166_v5 = vsub.f32 %v3003_v36, %v2162_v63  ;;  %v2160_v9 = vpop.permute.xlu1 %2159 }
0x146d   :  { %v2165_v47 = vsub.f32 %v2146_v44, %v2160_v9 }
0x146e   :  { %v2180_v0 = vadd.f32 1e-05, %v2166_v5 }
0x146f   :  { %v2179_v18 = vadd.f32 1e-05, %v2165_v47 }
0x1470   :  { %3383 = vrsqrt.f32 %v2180_v0 }
0x1471   :  { %3385 = vrsqrt.f32 %v2179_v18 }
0x147a   :  { %v3384_v20 = vpop.eup %3383 }
0x147b   :  { %v3386_v10 = vpop.eup %3385  ;;  %2190 = vperm.xlu0 %3347, %v3384_v20  }
0x147c   :  { %2185 = vperm.xlu1 %3354, %v3386_v10  }
0x147d   :  { %v2170_v51 = vpop.permute.xlu1 %2169 }
0x147e   :  { %v2177_v61 = vsub.f32 %v4125_v42, %v2170_v51 }
0x1481   :  { %v2175_v11 = vpop.permute.xlu1 %2174 }
0x1482   :  { %v2178_v12 = vsub.f32 %v4122_v39, %v2175_v11 }
0x14fa   :  { %v2191_v6 = vpop.permute.xlu0 %2190 }
0x14fb   :  { %v2194_v2 = vmul.f32 %v2191_v6, %v2178_v12  ;;  %v2186_v7 = vpop.permute.xlu1 %2185 }
0x14fc   :  { %v2193_v8 = vmul.f32 %v2186_v7, %v2177_v61 }
0x14fd   :  { %v2196_v23 = vmul.f32 %v3389_v15, %v2194_v2 }
0x14fe   :  { %v2195_v52 = vmul.f32 %v3390_v45, %v2193_v8 }
0x14ff   :  { %v2198_v28 = vadd.f32 %v3392_v50, %v2196_v23 }
0x1500   :  { %v2197_v43 = vadd.f32 %v3391_v21, %v2195_v52 }
0x1502   :  { %3012 = vmatprep.mubr.msk.f32.mxu1 %vm140_vm1, %v2197_v43 }
0x1503   :  { %3013 = vmatmul.mubr.msk.f32.vlgmr.msra.gmra.mrb[32].mxu1 %vm140_vm1, %v2198_v28 }
0x1504   :  { %3054 = vmatprep.mubr.msk.f32.mxu1 %vm3422_vm13, %v3423_v35 }
0x15d6   :  { %v3014_v31 = vpop.f32.mrb[32].mxu1 }
0x15d7   :  { %v2277_v16 = vadd.f32 %v3014_v31, %v3976_v40  ;;  %v2271_v17 = vpop.f32.mrb[33].mxu1 }
0x15d8   :  { %v2272_v13 = vadd.f32 %v3976_v40, %v2271_v17 }
0x15d9   :  { %v2281_v25 = vmax.f32 %v2277_v16, 0.0 }
0x15da   :  { %v2280_v14 = vmax.f32 %v2272_v13, 0.0 }
0x15dc   :  { %3047 = vmatprep.mubr.f32.mxu0 %v2280_v14 }
0x15dd   :  { %3048 = vmatmul.mubr.f32.vlgmr.msra.gmra.mrb[12].mxu0 %v2281_v25 }
0x16b0   :  { %v3049_v55 = vpop.f32.mrb[12].mxu0 }
0x16b1   :  { %v2354_v41 = vadd.f32 %v3049_v55, %v3983_v58  ;;  %v2348_v26 = vpop.f32.mrb[13].mxu0 }
0x16b2   :  { %v2349_v46 = vadd.f32 %v3983_v58, %v2348_v26  ;;  %v2361_v58 = vld [vmem:[%s4216_s1 + $0x78] sm:$0x3] }
0x16b3   :  { %v2358_v48 = vmax.f32 %v2354_v41, 0.0 }
0x16b4   :  { %v2357_v33 = vmax.f32 %v2349_v46, 0.0 }
0x16b5   :  { %v2360_v49 = vadd.f32 %v2358_v48, %v4122_v39  ;;  %v2440_v39 = vld [vmem:[%s4217_s2 + $0x1f0] sm:$0xff] }
0x16b6   :  { %v2359_v40 = vadd.f32 %v2357_v33, %v4125_v42  ;;  %v2441_v42 = vld [vmem:[%s4217_s2 + $0x1f8] sm:$0xff]  ;;  %s3393_s2 = scalar_lea.vmem %s2529_s17, 32 }
0x16b7   :  { %v3336_v62 = vpack.c.bf16 %v2441_v42, %v2440_v39  ;;  %p3394_p0 = scmp.ne.s32.totalorder %s2529_s17, %s3393_s2  ;;  %p3399_p2 = scmp.lt.s32.totalorder %s3393_s2, %s3393_s2 }
0x16b8   :  { %v3329_v53 = vpack.c.bf16 %v2360_v49, %v2359_v40 }
0x16b9   :  { %p3400_p3 = por %p3399_p2, %p3398_p1 }
0x16ba   :  { %3331 = vmatpush3.bf16.msk.msra.mxu1 %vm3573_vm7, %v3329_v53 }
0x16bb   :  { %3332 = vmatprep.subr.bf16.mxu1 %v3417_v3  ;;  %p3401_p4 = pnand %p3400_p3, %p3394_p0 }
0x16bd   :  { %3055 = vmatmul.mubr.msk.f32.vlgmr.msra.gmra.mrb[34].mxu1 %vm159_vm3, %v2361_v58 }
0x16be   :  { %3334 = vmatpush3.bf16.msra.mxu1 %v3333_v57  ;;  %3065 = vmatprep.mubr.msk.f32.mxu1 %vm3422_vm13, %v3423_v35 }
0x16bf   :  { %3335 = vmatprep.subr.bf16.mxu1 %v3417_v3 }
0x16c2   :  { %3337 = vmatpush3.bf16.msra.mxu1 %v3336_v62 }
0x1790   :  { %v2434_v38 = vpop.f32.mrb[34].mxu1 }
0x1791   :  { %v3056_v54 = vpop.f32.mrb[35].mxu1  ;;  %3066 = vmatmul.mubr.msk.f32.vlgmr.msra.gmra.mrb[36].mxu1 %vm140_vm1, %v2434_v38 }
0x1864   :  { %v2516_v19 = vpop.f32.mrb[36].mxu1 }
0x1865   :  { %v2517_v22 = vadd.f32 %v2600_v4, %v2516_v19  ;;  %v3067_v56 = vpop.f32.mrb[37].mxu1 }
0x1867   :  { %2521 = vst.msk [vmem:[#allocation2] sm:$0x3] %vm2520_vm14, %v2517_v22 }
0x1868   :  { %3404 = shalt.err (!%p3401_p4)
}
0x1869   :  { %s3405_s19 = scalar_lea.hbm %s4218_s3, 32 }
0x186a   :  { %p3406_p5 = scmp.ne.s32.totalorder %s4218_s3, %s3405_s19  ;;  %p3409_p6 = scmp.lt.u32.totalorder %s3405_s19, %s4218_s3 }
0x186c   :  { %p3411_p7 = pnand %p3409_p6, %p3406_p5 }
0x186e   :  { %3414 = shalt.err (!%p3411_p7)
}
0x186f   :  { %2531 = dma.vmem_to_hbm [thread:$0]  %s2529_s17, 32, %s4218_s3, [#allocation3]  }
0x1870   :  { %3415 = dma.done.wait [#allocation3], 32  }
0x1871   :  { %3416 = vsyncadd [#allocation3], 4294967264 }
0x1872   :  { %2535 = vsyncpa [#allocation3], 1 }

</bundles_post_ra>
